<compile_context>
chip_gen: v6e
topology: v6e:2x2x1
jax: 0.10.0
libtpu: 0.0.40
codegen_flags: <defaults>
</compile_context>

<pallas_src>
import functools
import math

import jax
import jax.numpy as jnp
from jax.experimental import pallas as pl
from jax.experimental.pallas import tpu as pltpu


def _round_up(a, m):
    return (a + m - 1) // m * m


# ----------------------------------------------------------------------------
# Kernel 1: tiled input projection (x @ W^T) + global BN statistics.
# ----------------------------------------------------------------------------
def _proj_stats_kernel(x_ref, wt_ref, w_ref, sum_ref, ssq_ref):
    i = pl.program_id(0)
    # (bn, F) bf16 @ (F, 2H) bf16 -> (bn, 2H) f32 on the MXU
    w = jnp.dot(x_ref[...], wt_ref[...], preferred_element_type=jnp.float32)
    w_ref[...] = w.astype(w_ref.dtype)

    @pl.when(i == 0)
    def _():
        sum_ref[...] = jnp.zeros_like(sum_ref)
        ssq_ref[...] = jnp.zeros_like(ssq_ref)

    sum_ref[...] += jnp.sum(w, axis=0, keepdims=True)
    ssq_ref[...] += jnp.sum(w * w, axis=0, keepdims=True)


def project_and_stats(x2d, w_t, row_block):
    n, f = x2d.shape
    two_h = w_t.shape[1]
    return pl.pallas_call(
        _proj_stats_kernel,
        out_shape=(
            jax.ShapeDtypeStruct((n, two_h), jnp.bfloat16),   # projected w
            jax.ShapeDtypeStruct((1, two_h), jnp.float32),    # column sums
            jax.ShapeDtypeStruct((1, two_h), jnp.float32),    # column sum-sq
        ),
        grid=(n // row_block,),
        in_specs=[
            pl.BlockSpec((row_block, f), lambda i: (i, 0)),
            pl.BlockSpec((f, two_h), lambda i: (0, 0)),
        ],
        out_specs=(
            pl.BlockSpec((row_block, two_h), lambda i: (i, 0)),
            pl.BlockSpec((1, two_h), lambda i: (0, 0)),
            pl.BlockSpec((1, two_h), lambda i: (0, 0)),
        ),
        compiler_params=pltpu.CompilerParams(
            dimension_semantics=("arbitrary",)),   # stats accumulate across blocks
    )(x2d, w_t)


# ----------------------------------------------------------------------------
# Kernel 2: recurrent scan.  Grid = (batch_blocks, time_blocks); each grid
# step runs Tc timesteps; hidden state carried in VMEM scratch.
# BN apply (w*scale + shift) fused here so w is only streamed once.
# ----------------------------------------------------------------------------
def _ligru_scan_kernel(h0_ref, w_ref, u_ref, scale_ref, shift_ref,
                       out_ref, h_scr, *, tc, hidden):
    @pl.when(pl.program_id(1) == 0)
    def _():
        h_scr[...] = h0_ref[...]

    scale = scale_ref[...]          # (1, 2H) f32
    shift = shift_ref[...]          # (1, 2H) f32
    u = u_ref[...]                  # (H, 2H) bf16 (fused [Ua | Uz])
    h = h_scr[...]                  # (Bb, H) f32

    for tt in range(tc):            # static unroll over the time block
        # BN applied on the fly, in f32.
        w_t = w_ref[tt].astype(jnp.float32) * scale + shift            # (Bb, 2H)
        gates = w_t + jnp.dot(h.astype(jnp.bfloat16), u,
                              preferred_element_type=jnp.float32)      # (Bb, 2H)
        zt = jax.nn.sigmoid(gates[:, hidden:])
        hcand = jnp.maximum(gates[:, :hidden], 0.0)   # relu; drop_mask == 1.0
        h = h + (1.0 - zt) * (hcand - h)              # == zt*h + (1-zt)*hcand
        out_ref[tt] = h.astype(out_ref.dtype)

    h_scr[...] = h


def ligru_scan(w_tm, u_t, scale, shift, h0, *, time_block, batch_block):
    t_pad, b, two_h = w_tm.shape
    hidden = two_h // 2
    nb = b // batch_block
    nt = t_pad // time_block
    return pl.pallas_call(
        functools.partial(_ligru_scan_kernel, tc=time_block, hidden=hidden),
        out_shape=jax.ShapeDtypeStruct((t_pad, b, hidden), jnp.float32),
        grid=(nb, nt),
        in_specs=[
            pl.BlockSpec((batch_block, hidden), lambda bb, tb: (bb, 0)),        # h0
            pl.BlockSpec((time_block, batch_block, two_h),
                         lambda bb, tb: (tb, bb, 0)),                            # w
            pl.BlockSpec((hidden, two_h), lambda bb, tb: (0, 0)),                # U^T
            pl.BlockSpec((1, two_h), lambda bb, tb: (0, 0)),                     # scale
            pl.BlockSpec((1, two_h), lambda bb, tb: (0, 0)),                     # shift
        ],
        out_specs=pl.BlockSpec((time_block, batch_block, hidden),
                               lambda bb, tb: (tb, bb, 0)),
        scratch_shapes=[pltpu.VMEM((batch_block, hidden), jnp.float32)],
        compiler_params=pltpu.CompilerParams(
            dimension_semantics=("parallel", "arbitrary")),   # batch || , time serial
    )(h0, w_tm, u_t, scale, shift)


# ----------------------------------------------------------------------------
# LiGRU_Layer forward.
# ----------------------------------------------------------------------------
@functools.partial(jax.jit, static_argnums=(2, 4))
def ligru_layer_forward(x, params, hidden_size, hx, time_block):
    B, T, F = x.shape
    H = hidden_size
    two_h = 2 * H

    # --- time-major layout so the projection emits w directly in scan layout.
    tc = max(1, min(time_block, T))
    t_pad = _round_up(T, tc)
    x_tm = jnp.transpose(x, (1, 0, 2)).astype(jnp.bfloat16)          # (T, B, F)
    if t_pad != T:
        x_tm = jnp.pad(x_tm, ((0, t_pad - T), (0, 0), (0, 0)))       # zero pad
    n_rows = t_pad * B
    x2d = x_tm.reshape(n_rows, F)

    # --- projection row tiling (zero rows are harmless: stats divide by B*T).
    row_block = min(512, _round_up(n_rows, 8))
    n_pad = _round_up(n_rows, row_block)
    if n_pad != n_rows:
        x2d = jnp.pad(x2d, ((0, n_pad - n_rows), (0, 0)))

    w2d, col_sum, col_ssq = project_and_stats(
        x2d, params["W_t"].astype(jnp.bfloat16), row_block)

    # --- BatchNorm1d (training-mode batch stats, biased variance, eps=1e-5).
    count = float(B * T)
    mean = col_sum / count
    var = col_ssq / count - mean * mean
    scale = params["gamma"] * jax.lax.rsqrt(var + 1e-5)              # (1, 2H)
    shift = params["beta"] - mean * scale                            # (1, 2H)

    w_tm = w2d[:n_rows].reshape(t_pad, B, two_h)                     # bf16

    if hx is None:
        h0 = jnp.zeros((B, H), jnp.float32)                          # h_init == 0
    else:
        h0 = jnp.broadcast_to(hx, (B, H)).astype(jnp.float32)

    # Two batch blocks when possible so v7x megacore can shard the scan.
    batch_block = B // 2 if (B % 16 == 0) else B

    h_tm = ligru_scan(w_tm, params["U_t"].astype(jnp.bfloat16),
                      scale.astype(jnp.float32), shift.astype(jnp.float32),
                      h0, time_block=tc, batch_block=batch_block)    # (t_pad, B, H)

    return jnp.transpose(h_tm[:T], (1, 0, 2))                        # (B, T, H)


# ----------------------------------------------------------------------------
# Parameter init (mirrors the PyTorch module's nn.Linear defaults and
# BatchNorm1d(2H): gamma=1, beta=0).
# ----------------------------------------------------------------------------
def init_params(key, input_size, hidden_size):
    k1, k2 = jax.random.split(key)
    bw = 1.0 / math.sqrt(input_size)
    W = jax.random.uniform(k1, (2 * hidden_size, input_size), jnp.float32, -bw, bw)
    bu = 1.0 / math.sqrt(hidden_size)
    U = jax.random.uniform(k2, (2 * hidden_size, hidden_size), jnp.float32, -bu, bu)
    return dict(
        W_t=W.T,                                   # (F, 2H)
        U_t=U.T,                                   # (H, 2H) == [Ua^T | Uz^T]
        gamma=jnp.ones((1, 2 * hidden_size), jnp.float32),
        beta=jnp.zeros((1, 2 * hidden_size), jnp.float32),
    )


# Pure f32 JAX reference (module semantics) for validation.
def ref_forward(x, params, hidden_size):
    B, T, F = x.shape
    H = hidden_size
    w = x.reshape(B * T, F) @ params["W_t"]
    mean = jnp.mean(w, axis=0, keepdims=True)
    var = jnp.mean((w - mean) ** 2, axis=0, keepdims=True)
    w = (w - mean) * jax.lax.rsqrt(var + 1e-5) * params["gamma"] + params["beta"]
    w = w.reshape(B, T, 2 * H)
    h = jnp.zeros((B, H), jnp.float32)
    outs = []
    for t in range(T):
        gates = w[:, t] + h @ params["U_t"]
        zt = jax.nn.sigmoid(gates[:, H:])
        hcand = jnp.maximum(gates[:, :H], 0.0)
        h = zt * h + (1.0 - zt) * hcand
        outs.append(h)
    return jnp.stack(outs, axis=1)


if __name__ == "__main__":
    B, T, F, H = 8, 12, 16, 128
    key = jax.random.PRNGKey(0)
    kx, kp = jax.random.split(key)
    x = jax.random.normal(kx, (B, T, F), jnp.float32)
    params = init_params(kp, F, H)

    h = ligru_layer_forward(x, params, H, None, 8)
    jax.block_until_ready(h)

    assert h.shape == (B, T, H), h.shape
    assert bool(jnp.all(jnp.isfinite(h)))

    h_ref = ref_forward(x, params, H)
    err = float(jnp.max(jnp.abs(h - h_ref)))
    # bf16 MXU operands vs f32 reference: allow a loose tolerance.
    assert err < 1e-1, f"max abs err vs f32 reference too large: {err}"

    print("KERNEL_OK")
</pallas_src>

<mosaic_0001>
module attributes {stable_mosaic.version = 11 : i64} {
  func.func @_proj_stats_kernel(%arg0: i32, %arg1: memref<128x16xbf16, #tpu.memory_space<vmem>>, %arg2: memref<16x256xbf16, #tpu.memory_space<vmem>>, %arg3: memref<128x256xbf16, #tpu.memory_space<vmem>>, %arg4: memref<1x256xf32, #tpu.memory_space<vmem>>, %arg5: memref<1x256xf32, #tpu.memory_space<vmem>>) attributes {dimension_semantics = [#tpu.dimension_semantics<arbitrary>], iteration_bounds = array<i64: 1>, scalar_prefetch = 0 : i64, scratch_operands = 0 : i64, tpu.core_type = #tpu.core_type<tc>, window_params = [{transform_indices = @transform_0, window_bounds = array<i64: 128, 16>}, {pipeline_mode = #tpu.pipeline_mode<synchronous>, transform_indices = @transform_1, window_bounds = array<i64: 16, 256>}, {transform_indices = @transform_2, window_bounds = array<i64: 128, 256>}, {pipeline_mode = #tpu.pipeline_mode<synchronous>, transform_indices = @transform_3, window_bounds = array<i64: 1, 256>}, {pipeline_mode = #tpu.pipeline_mode<synchronous>, transform_indices = @transform_4, window_bounds = array<i64: 1, 256>}]} {
    %c0 = arith.constant 0 : index
    %c0_0 = arith.constant 0 : index
    %0 = vector.load %arg1[%c0, %c0_0] : memref<128x16xbf16, #tpu.memory_space<vmem>>, vector<128x16xbf16>
    %c0_1 = arith.constant 0 : index
    %c0_2 = arith.constant 0 : index
    %1 = vector.load %arg2[%c0_1, %c0_2] : memref<16x256xbf16, #tpu.memory_space<vmem>>, vector<16x256xbf16>
    %cst = arith.constant dense<0.000000e+00> : vector<128x256xf32>
    %2 = tpu.matmul %0, %1, %cst {dimension_numbers = #tpu.dot_dimension_numbers<[1], [0], [0], [1], [0, 0, 1, 1], [], []>} : vector<128x16xbf16>, vector<16x256xbf16>, vector<128x256xf32> -> vector<128x256xf32>
    %3 = arith.truncf %2 : vector<128x256xf32> to vector<128x256xbf16>
    %c0_3 = arith.constant 0 : index
    %c0_4 = arith.constant 0 : index
    %4 = vector.load %arg3[%c0_3, %c0_4] : memref<128x256xbf16, #tpu.memory_space<vmem>>, vector<128x256xbf16>
    tpu.vector_store %arg3[%c0_3, %c0_4], %3 {strides = array<i32>} : memref<128x256xbf16, #tpu.memory_space<vmem>>, vector<128x256xbf16>,
    %c0_i32 = arith.constant 0 : i32
    %5 = arith.cmpi eq, %arg0, %c0_i32 : i32
    %6 = arith.extui %5 : i1 to i32
    %c0_i32_5 = arith.constant 0 : i32
    %7 = arith.cmpi ne, %6, %c0_i32_5 : i32
    scf.if %7 {
      %cst_16 = arith.constant 0.000000e+00 : f32
      %19 = vector.broadcast %cst_16 : f32 to vector<1x256xf32>
      %c0_17 = arith.constant 0 : index
      %c0_18 = arith.constant 0 : index
      %20 = vector.load %arg4[%c0_17, %c0_18] : memref<1x256xf32, #tpu.memory_space<vmem>>, vector<1x256xf32>
      tpu.vector_store %arg4[%c0_17, %c0_18], %19 {strides = array<i32>} : memref<1x256xf32, #tpu.memory_space<vmem>>, vector<1x256xf32>,
      %cst_19 = arith.constant 0.000000e+00 : f32
      %21 = vector.broadcast %cst_19 : f32 to vector<1x256xf32>
      %c0_20 = arith.constant 0 : index
      %c0_21 = arith.constant 0 : index
      %22 = vector.load %arg5[%c0_20, %c0_21] : memref<1x256xf32, #tpu.memory_space<vmem>>, vector<1x256xf32>
      tpu.vector_store %arg5[%c0_20, %c0_21], %21 {strides = array<i32>} : memref<1x256xf32, #tpu.memory_space<vmem>>, vector<1x256xf32>,
    } else {
    }
    %c0_6 = arith.constant 0 : index
    %c0_7 = arith.constant 0 : index
    %8 = vector.load %arg4[%c0_6, %c0_7] : memref<1x256xf32, #tpu.memory_space<vmem>>, vector<1x256xf32>
    %cst_8 = arith.constant dense<0.000000e+00> : vector<256xf32>
    %9 = vector.multi_reduction <add>, %2, %cst_8 [0] : vector<128x256xf32> to vector<256xf32>
    %10 = vector.shape_cast %9 : vector<256xf32> to vector<1x256xf32>
    %11 = arith.addf %8, %10 : vector<1x256xf32>
    %c0_9 = arith.constant 0 : index
    %c0_10 = arith.constant 0 : index
    %12 = vector.load %arg4[%c0_9, %c0_10] : memref<1x256xf32, #tpu.memory_space<vmem>>, vector<1x256xf32>
    tpu.vector_store %arg4[%c0_9, %c0_10], %11 {strides = array<i32>} : memref<1x256xf32, #tpu.memory_space<vmem>>, vector<1x256xf32>,
    %c0_11 = arith.constant 0 : index
    %c0_12 = arith.constant 0 : index
    %13 = vector.load %arg5[%c0_11, %c0_12] : memref<1x256xf32, #tpu.memory_space<vmem>>, vector<1x256xf32>
    %14 = arith.mulf %2, %2 : vector<128x256xf32>
    %cst_13 = arith.constant dense<0.000000e+00> : vector<256xf32>
    %15 = vector.multi_reduction <add>, %14, %cst_13 [0] : vector<128x256xf32> to vector<256xf32>
    %16 = vector.shape_cast %15 : vector<256xf32> to vector<1x256xf32>
    %17 = arith.addf %13, %16 : vector<1x256xf32>
    %c0_14 = arith.constant 0 : index
    %c0_15 = arith.constant 0 : index
    %18 = vector.load %arg5[%c0_14, %c0_15] : memref<1x256xf32, #tpu.memory_space<vmem>>, vector<1x256xf32>
    tpu.vector_store %arg5[%c0_14, %c0_15], %17 {strides = array<i32>} : memref<1x256xf32, #tpu.memory_space<vmem>>, vector<1x256xf32>,
    return
  }
  func.func @transform_0(%arg0: i32) -> (i32, i32) {
    %c0_i32 = arith.constant 0 : i32
    %c0_i32_0 = arith.constant 0 : i32
    return %arg0, %c0_i32 : i32, i32
  }
  func.func @transform_1(%arg0: i32) -> (i32, i32) {
    %c0_i32 = arith.constant 0 : i32
    %c0_i32_0 = arith.constant 0 : i32
    %c0_i32_1 = arith.constant 0 : i32
    return %c0_i32, %c0_i32_0 : i32, i32
  }
  func.func @transform_2(%arg0: i32) -> (i32, i32) {
    %c0_i32 = arith.constant 0 : i32
    %c0_i32_0 = arith.constant 0 : i32
    return %arg0, %c0_i32 : i32, i32
  }
  func.func @transform_3(%arg0: i32) -> (i32, i32) {
    %c0_i32 = arith.constant 0 : i32
    %c0_i32_0 = arith.constant 0 : i32
    %c0_i32_1 = arith.constant 0 : i32
    return %c0_i32, %c0_i32_0 : i32, i32
  }
  func.func @transform_4(%arg0: i32) -> (i32, i32) {
    %c0_i32 = arith.constant 0 : i32
    %c0_i32_0 = arith.constant 0 : i32
    %c0_i32_1 = arith.constant 0 : i32
    return %c0_i32, %c0_i32_0 : i32, i32
  }
}

module attributes {stable_mosaic.version = 11 : i64} {
  func.func @_ligru_scan_kernel(%arg0: i32, %arg1: i32, %arg2: memref<8x128xf32, #tpu.memory_space<vmem>>, %arg3: memref<8x8x256xbf16, #tpu.memory_space<vmem>>, %arg4: memref<128x256xbf16, #tpu.memory_space<vmem>>, %arg5: memref<1x256xf32, #tpu.memory_space<vmem>>, %arg6: memref<1x256xf32, #tpu.memory_space<vmem>>, %arg7: memref<8x8x128xf32, #tpu.memory_space<vmem>>, %arg8: memref<8x128xf32, #tpu.memory_space<vmem>>) attributes {dimension_semantics = [#tpu.dimension_semantics<parallel>, #tpu.dimension_semantics<arbitrary>], iteration_bounds = array<i64: 1, 2>, scalar_prefetch = 0 : i64, scratch_operands = 1 : i64, tpu.core_type = #tpu.core_type<tc>, window_params = [{transform_indices = @transform_0, window_bounds = array<i64: 8, 128>}, {transform_indices = @transform_1, window_bounds = array<i64: 8, 8, 256>}, {pipeline_mode = #tpu.pipeline_mode<synchronous>, transform_indices = @transform_2, window_bounds = array<i64: 128, 256>}, {pipeline_mode = #tpu.pipeline_mode<synchronous>, transform_indices = @transform_3, window_bounds = array<i64: 1, 256>}, {pipeline_mode = #tpu.pipeline_mode<synchronous>, transform_indices = @transform_4, window_bounds = array<i64: 1, 256>}, {transform_indices = @transform_5, window_bounds = array<i64: 8, 8, 128>}]} {
    %c0_i32 = arith.constant 0 : i32
    %0 = arith.cmpi eq, %arg1, %c0_i32 : i32
    %1 = arith.extui %0 : i1 to i32
    %c0_i32_0 = arith.constant 0 : i32
    %2 = arith.cmpi ne, %1, %c0_i32_0 : i32
    scf.if %2 {
      %c0_82 = arith.constant 0 : index
      %c0_83 = arith.constant 0 : index
      %224 = vector.load %arg2[%c0_82, %c0_83] : memref<8x128xf32, #tpu.memory_space<vmem>>, vector<8x128xf32>
      %c0_84 = arith.constant 0 : index
      %c0_85 = arith.constant 0 : index
      %225 = vector.load %arg8[%c0_84, %c0_85] : memref<8x128xf32, #tpu.memory_space<vmem>>, vector<8x128xf32>
      tpu.vector_store %arg8[%c0_84, %c0_85], %224 {strides = array<i32>} : memref<8x128xf32, #tpu.memory_space<vmem>>, vector<8x128xf32>,
    } else {
    }
    %c0 = arith.constant 0 : index
    %c0_1 = arith.constant 0 : index
    %3 = vector.load %arg5[%c0, %c0_1] : memref<1x256xf32, #tpu.memory_space<vmem>>, vector<1x256xf32>
    %c0_2 = arith.constant 0 : index
    %c0_3 = arith.constant 0 : index
    %4 = vector.load %arg6[%c0_2, %c0_3] : memref<1x256xf32, #tpu.memory_space<vmem>>, vector<1x256xf32>
    %c0_4 = arith.constant 0 : index
    %c0_5 = arith.constant 0 : index
    %5 = vector.load %arg4[%c0_4, %c0_5] : memref<128x256xbf16, #tpu.memory_space<vmem>>, vector<128x256xbf16>
    %c0_6 = arith.constant 0 : index
    %c0_7 = arith.constant 0 : index
    %6 = vector.load %arg8[%c0_6, %c0_7] : memref<8x128xf32, #tpu.memory_space<vmem>>, vector<8x128xf32>
    %c0_8 = arith.constant 0 : index
    %c0_9 = arith.constant 0 : index
    %c0_10 = arith.constant 0 : index
    %7 = vector.load %arg3[%c0_8, %c0_9, %c0_10] : memref<8x8x256xbf16, #tpu.memory_space<vmem>>, vector<1x8x256xbf16>
    %8 = vector.shape_cast %7 : vector<1x8x256xbf16> to vector<8x256xbf16>
    %9 = arith.extf %8 : vector<8x256xbf16> to vector<8x256xf32>
    %10 = vector.broadcast %3 : vector<1x256xf32> to vector<8x256xf32>
    %11 = arith.mulf %9, %10 : vector<8x256xf32>
    %12 = vector.broadcast %4 : vector<1x256xf32> to vector<8x256xf32>
    %13 = arith.addf %11, %12 : vector<8x256xf32>
    %14 = arith.truncf %6 : vector<8x128xf32> to vector<8x128xbf16>
    %cst = arith.constant dense<0.000000e+00> : vector<8x256xf32>
    %15 = tpu.matmul %14, %5, %cst {dimension_numbers = #tpu.dot_dimension_numbers<[1], [0], [0], [1], [0, 0, 1, 1], [], []>} : vector<8x128xbf16>, vector<128x256xbf16>, vector<8x256xf32> -> vector<8x256xf32>
    %16 = arith.addf %13, %15 : vector<8x256xf32>
    %17 = vector.extract_strided_slice %16 {offsets = [0, 128], sizes = [8, 128], strides = [1, 1]} : vector<8x256xf32> to vector<8x128xf32>
    %18 = arith.negf %17 : vector<8x128xf32>
    %19 = math.exp %18 : vector<8x128xf32>
    %cst_11 = arith.constant 1.000000e+00 : f32
    %20 = vector.broadcast %cst_11 : f32 to vector<8x128xf32>
    %21 = arith.addf %20, %19 : vector<8x128xf32>
    %22 = arith.divf %20, %21 : vector<8x128xf32>
    %23 = vector.extract_strided_slice %16 {offsets = [0, 0], sizes = [8, 128], strides = [1, 1]} : vector<8x256xf32> to vector<8x128xf32>
    %cst_12 = arith.constant 0.000000e+00 : f32
    %24 = vector.broadcast %cst_12 : f32 to vector<8x128xf32>
    %25 = arith.maximumf %23, %24 : vector<8x128xf32>
    %cst_13 = arith.constant 1.000000e+00 : f32
    %26 = vector.broadcast %cst_13 : f32 to vector<8x128xf32>
    %27 = arith.subf %26, %22 : vector<8x128xf32>
    %28 = arith.subf %25, %6 : vector<8x128xf32>
    %29 = arith.mulf %27, %28 : vector<8x128xf32>
    %30 = arith.addf %6, %29 : vector<8x128xf32>
    %c0_14 = arith.constant 0 : index
    %c0_15 = arith.constant 0 : index
    %c0_16 = arith.constant 0 : index
    %31 = vector.load %arg7[%c0_14, %c0_15, %c0_16] : memref<8x8x128xf32, #tpu.memory_space<vmem>>, vector<1x8x128xf32>
    %32 = vector.shape_cast %31 : vector<1x8x128xf32> to vector<8x128xf32>
    %33 = vector.shape_cast %30 : vector<8x128xf32> to vector<1x8x128xf32>
    tpu.vector_store %arg7[%c0_14, %c0_15, %c0_16], %33 {strides = array<i32>} : memref<8x8x128xf32, #tpu.memory_space<vmem>>, vector<1x8x128xf32>,
    %c1 = arith.constant 1 : index
    %c0_17 = arith.constant 0 : index
    %c0_18 = arith.constant 0 : index
    %34 = vector.load %arg3[%c1, %c0_17, %c0_18] : memref<8x8x256xbf16, #tpu.memory_space<vmem>>, vector<1x8x256xbf16>
    %35 = vector.shape_cast %34 : vector<1x8x256xbf16> to vector<8x256xbf16>
    %36 = arith.extf %35 : vector<8x256xbf16> to vector<8x256xf32>
    %37 = vector.broadcast %3 : vector<1x256xf32> to vector<8x256xf32>
    %38 = arith.mulf %36, %37 : vector<8x256xf32>
    %39 = vector.broadcast %4 : vector<1x256xf32> to vector<8x256xf32>
    %40 = arith.addf %38, %39 : vector<8x256xf32>
    %41 = arith.truncf %30 : vector<8x128xf32> to vector<8x128xbf16>
    %cst_19 = arith.constant dense<0.000000e+00> : vector<8x256xf32>
    %42 = tpu.matmul %41, %5, %cst_19 {dimension_numbers = #tpu.dot_dimension_numbers<[1], [0], [0], [1], [0, 0, 1, 1], [], []>} : vector<8x128xbf16>, vector<128x256xbf16>, vector<8x256xf32> -> vector<8x256xf32>
    %43 = arith.addf %40, %42 : vector<8x256xf32>
    %44 = vector.extract_strided_slice %43 {offsets = [0, 128], sizes = [8, 128], strides = [1, 1]} : vector<8x256xf32> to vector<8x128xf32>
    %45 = arith.negf %44 : vector<8x128xf32>
    %46 = math.exp %45 : vector<8x128xf32>
    %cst_20 = arith.constant 1.000000e+00 : f32
    %47 = vector.broadcast %cst_20 : f32 to vector<8x128xf32>
    %48 = arith.addf %47, %46 : vector<8x128xf32>
    %49 = arith.divf %47, %48 : vector<8x128xf32>
    %50 = vector.extract_strided_slice %43 {offsets = [0, 0], sizes = [8, 128], strides = [1, 1]} : vector<8x256xf32> to vector<8x128xf32>
    %cst_21 = arith.constant 0.000000e+00 : f32
    %51 = vector.broadcast %cst_21 : f32 to vector<8x128xf32>
    %52 = arith.maximumf %50, %51 : vector<8x128xf32>
    %cst_22 = arith.constant 1.000000e+00 : f32
    %53 = vector.broadcast %cst_22 : f32 to vector<8x128xf32>
    %54 = arith.subf %53, %49 : vector<8x128xf32>
    %55 = arith.subf %52, %30 : vector<8x128xf32>
    %56 = arith.mulf %54, %55 : vector<8x128xf32>
    %57 = arith.addf %30, %56 : vector<8x128xf32>
    %c1_23 = arith.constant 1 : index
    %c0_24 = arith.constant 0 : index
    %c0_25 = arith.constant 0 : index
    %58 = vector.load %arg7[%c1_23, %c0_24, %c0_25] : memref<8x8x128xf32, #tpu.memory_space<vmem>>, vector<1x8x128xf32>
    %59 = vector.shape_cast %58 : vector<1x8x128xf32> to vector<8x128xf32>
    %60 = vector.shape_cast %57 : vector<8x128xf32> to vector<1x8x128xf32>
    tpu.vector_store %arg7[%c1_23, %c0_24, %c0_25], %60 {strides = array<i32>} : memref<8x8x128xf32, #tpu.memory_space<vmem>>, vector<1x8x128xf32>,
    %c2 = arith.constant 2 : index
    %c0_26 = arith.constant 0 : index
    %c0_27 = arith.constant 0 : index
    %61 = vector.load %arg3[%c2, %c0_26, %c0_27] : memref<8x8x256xbf16, #tpu.memory_space<vmem>>, vector<1x8x256xbf16>
    %62 = vector.shape_cast %61 : vector<1x8x256xbf16> to vector<8x256xbf16>
    %63 = arith.extf %62 : vector<8x256xbf16> to vector<8x256xf32>
    %64 = vector.broadcast %3 : vector<1x256xf32> to vector<8x256xf32>
    %65 = arith.mulf %63, %64 : vector<8x256xf32>
    %66 = vector.broadcast %4 : vector<1x256xf32> to vector<8x256xf32>
    %67 = arith.addf %65, %66 : vector<8x256xf32>
    %68 = arith.truncf %57 : vector<8x128xf32> to vector<8x128xbf16>
    %cst_28 = arith.constant dense<0.000000e+00> : vector<8x256xf32>
    %69 = tpu.matmul %68, %5, %cst_28 {dimension_numbers = #tpu.dot_dimension_numbers<[1], [0], [0], [1], [0, 0, 1, 1], [], []>} : vector<8x128xbf16>, vector<128x256xbf16>, vector<8x256xf32> -> vector<8x256xf32>
    %70 = arith.addf %67, %69 : vector<8x256xf32>
    %71 = vector.extract_strided_slice %70 {offsets = [0, 128], sizes = [8, 128], strides = [1, 1]} : vector<8x256xf32> to vector<8x128xf32>
    %72 = arith.negf %71 : vector<8x128xf32>
    %73 = math.exp %72 : vector<8x128xf32>
    %cst_29 = arith.constant 1.000000e+00 : f32
    %74 = vector.broadcast %cst_29 : f32 to vector<8x128xf32>
    %75 = arith.addf %74, %73 : vector<8x128xf32>
    %76 = arith.divf %74, %75 : vector<8x128xf32>
    %77 = vector.extract_strided_slice %70 {offsets = [0, 0], sizes = [8, 128], strides = [1, 1]} : vector<8x256xf32> to vector<8x128xf32>
    %cst_30 = arith.constant 0.000000e+00 : f32
    %78 = vector.broadcast %cst_30 : f32 to vector<8x128xf32>
    %79 = arith.maximumf %77, %78 : vector<8x128xf32>
    %cst_31 = arith.constant 1.000000e+00 : f32
    %80 = vector.broadcast %cst_31 : f32 to vector<8x128xf32>
    %81 = arith.subf %80, %76 : vector<8x128xf32>
    %82 = arith.subf %79, %57 : vector<8x128xf32>
    %83 = arith.mulf %81, %82 : vector<8x128xf32>
    %84 = arith.addf %57, %83 : vector<8x128xf32>
    %c2_32 = arith.constant 2 : index
    %c0_33 = arith.constant 0 : index
    %c0_34 = arith.constant 0 : index
    %85 = vector.load %arg7[%c2_32, %c0_33, %c0_34] : memref<8x8x128xf32, #tpu.memory_space<vmem>>, vector<1x8x128xf32>
    %86 = vector.shape_cast %85 : vector<1x8x128xf32> to vector<8x128xf32>
    %87 = vector.shape_cast %84 : vector<8x128xf32> to vector<1x8x128xf32>
    tpu.vector_store %arg7[%c2_32, %c0_33, %c0_34], %87 {strides = array<i32>} : memref<8x8x128xf32, #tpu.memory_space<vmem>>, vector<1x8x128xf32>,
    %c3 = arith.constant 3 : index
    %c0_35 = arith.constant 0 : index
    %c0_36 = arith.constant 0 : index
    %88 = vector.load %arg3[%c3, %c0_35, %c0_36] : memref<8x8x256xbf16, #tpu.memory_space<vmem>>, vector<1x8x256xbf16>
    %89 = vector.shape_cast %88 : vector<1x8x256xbf16> to vector<8x256xbf16>
    %90 = arith.extf %89 : vector<8x256xbf16> to vector<8x256xf32>
    %91 = vector.broadcast %3 : vector<1x256xf32> to vector<8x256xf32>
    %92 = arith.mulf %90, %91 : vector<8x256xf32>
    %93 = vector.broadcast %4 : vector<1x256xf32> to vector<8x256xf32>
    %94 = arith.addf %92, %93 : vector<8x256xf32>
    %95 = arith.truncf %84 : vector<8x128xf32> to vector<8x128xbf16>
    %cst_37 = arith.constant dense<0.000000e+00> : vector<8x256xf32>
    %96 = tpu.matmul %95, %5, %cst_37 {dimension_numbers = #tpu.dot_dimension_numbers<[1], [0], [0], [1], [0, 0, 1, 1], [], []>} : vector<8x128xbf16>, vector<128x256xbf16>, vector<8x256xf32> -> vector<8x256xf32>
    %97 = arith.addf %94, %96 : vector<8x256xf32>
    %98 = vector.extract_strided_slice %97 {offsets = [0, 128], sizes = [8, 128], strides = [1, 1]} : vector<8x256xf32> to vector<8x128xf32>
    %99 = arith.negf %98 : vector<8x128xf32>
    %100 = math.exp %99 : vector<8x128xf32>
    %cst_38 = arith.constant 1.000000e+00 : f32
    %101 = vector.broadcast %cst_38 : f32 to vector<8x128xf32>
    %102 = arith.addf %101, %100 : vector<8x128xf32>
    %103 = arith.divf %101, %102 : vector<8x128xf32>
    %104 = vector.extract_strided_slice %97 {offsets = [0, 0], sizes = [8, 128], strides = [1, 1]} : vector<8x256xf32> to vector<8x128xf32>
    %cst_39 = arith.constant 0.000000e+00 : f32
    %105 = vector.broadcast %cst_39 : f32 to vector<8x128xf32>
    %106 = arith.maximumf %104, %105 : vector<8x128xf32>
    %cst_40 = arith.constant 1.000000e+00 : f32
    %107 = vector.broadcast %cst_40 : f32 to vector<8x128xf32>
    %108 = arith.subf %107, %103 : vector<8x128xf32>
    %109 = arith.subf %106, %84 : vector<8x128xf32>
    %110 = arith.mulf %108, %109 : vector<8x128xf32>
    %111 = arith.addf %84, %110 : vector<8x128xf32>
    %c3_41 = arith.constant 3 : index
    %c0_42 = arith.constant 0 : index
    %c0_43 = arith.constant 0 : index
    %112 = vector.load %arg7[%c3_41, %c0_42, %c0_43] : memref<8x8x128xf32, #tpu.memory_space<vmem>>, vector<1x8x128xf32>
    %113 = vector.shape_cast %112 : vector<1x8x128xf32> to vector<8x128xf32>
    %114 = vector.shape_cast %111 : vector<8x128xf32> to vector<1x8x128xf32>
    tpu.vector_store %arg7[%c3_41, %c0_42, %c0_43], %114 {strides = array<i32>} : memref<8x8x128xf32, #tpu.memory_space<vmem>>, vector<1x8x128xf32>,
    %c4 = arith.constant 4 : index
    %c0_44 = arith.constant 0 : index
    %c0_45 = arith.constant 0 : index
    %115 = vector.load %arg3[%c4, %c0_44, %c0_45] : memref<8x8x256xbf16, #tpu.memory_space<vmem>>, vector<1x8x256xbf16>
    %116 = vector.shape_cast %115 : vector<1x8x256xbf16> to vector<8x256xbf16>
    %117 = arith.extf %116 : vector<8x256xbf16> to vector<8x256xf32>
    %118 = vector.broadcast %3 : vector<1x256xf32> to vector<8x256xf32>
    %119 = arith.mulf %117, %118 : vector<8x256xf32>
    %120 = vector.broadcast %4 : vector<1x256xf32> to vector<8x256xf32>
    %121 = arith.addf %119, %120 : vector<8x256xf32>
    %122 = arith.truncf %111 : vector<8x128xf32> to vector<8x128xbf16>
    %cst_46 = arith.constant dense<0.000000e+00> : vector<8x256xf32>
    %123 = tpu.matmul %122, %5, %cst_46 {dimension_numbers = #tpu.dot_dimension_numbers<[1], [0], [0], [1], [0, 0, 1, 1], [], []>} : vector<8x128xbf16>, vector<128x256xbf16>, vector<8x256xf32> -> vector<8x256xf32>
    %124 = arith.addf %121, %123 : vector<8x256xf32>
    %125 = vector.extract_strided_slice %124 {offsets = [0, 128], sizes = [8, 128], strides = [1, 1]} : vector<8x256xf32> to vector<8x128xf32>
    %126 = arith.negf %125 : vector<8x128xf32>
    %127 = math.exp %126 : vector<8x128xf32>
    %cst_47 = arith.constant 1.000000e+00 : f32
    %128 = vector.broadcast %cst_47 : f32 to vector<8x128xf32>
    %129 = arith.addf %128, %127 : vector<8x128xf32>
    %130 = arith.divf %128, %129 : vector<8x128xf32>
    %131 = vector.extract_strided_slice %124 {offsets = [0, 0], sizes = [8, 128], strides = [1, 1]} : vector<8x256xf32> to vector<8x128xf32>
    %cst_48 = arith.constant 0.000000e+00 : f32
    %132 = vector.broadcast %cst_48 : f32 to vector<8x128xf32>
    %133 = arith.maximumf %131, %132 : vector<8x128xf32>
    %cst_49 = arith.constant 1.000000e+00 : f32
    %134 = vector.broadcast %cst_49 : f32 to vector<8x128xf32>
    %135 = arith.subf %134, %130 : vector<8x128xf32>
    %136 = arith.subf %133, %111 : vector<8x128xf32>
    %137 = arith.mulf %135, %136 : vector<8x128xf32>
    %138 = arith.addf %111, %137 : vector<8x128xf32>
    %c4_50 = arith.constant 4 : index
    %c0_51 = arith.constant 0 : index
    %c0_52 = arith.constant 0 : index
    %139 = vector.load %arg7[%c4_50, %c0_51, %c0_52] : memref<8x8x128xf32, #tpu.memory_space<vmem>>, vector<1x8x128xf32>
    %140 = vector.shape_cast %139 : vector<1x8x128xf32> to vector<8x128xf32>
    %141 = vector.shape_cast %138 : vector<8x128xf32> to vector<1x8x128xf32>
    tpu.vector_store %arg7[%c4_50, %c0_51, %c0_52], %141 {strides = array<i32>} : memref<8x8x128xf32, #tpu.memory_space<vmem>>, vector<1x8x128xf32>,
    %c5 = arith.constant 5 : index
    %c0_53 = arith.constant 0 : index
    %c0_54 = arith.constant 0 : index
    %142 = vector.load %arg3[%c5, %c0_53, %c0_54] : memref<8x8x256xbf16, #tpu.memory_space<vmem>>, vector<1x8x256xbf16>
    %143 = vector.shape_cast %142 : vector<1x8x256xbf16> to vector<8x256xbf16>
    %144 = arith.extf %143 : vector<8x256xbf16> to vector<8x256xf32>
    %145 = vector.broadcast %3 : vector<1x256xf32> to vector<8x256xf32>
    %146 = arith.mulf %144, %145 : vector<8x256xf32>
    %147 = vector.broadcast %4 : vector<1x256xf32> to vector<8x256xf32>
    %148 = arith.addf %146, %147 : vector<8x256xf32>
    %149 = arith.truncf %138 : vector<8x128xf32> to vector<8x128xbf16>
    %cst_55 = arith.constant dense<0.000000e+00> : vector<8x256xf32>
    %150 = tpu.matmul %149, %5, %cst_55 {dimension_numbers = #tpu.dot_dimension_numbers<[1], [0], [0], [1], [0, 0, 1, 1], [], []>} : vector<8x128xbf16>, vector<128x256xbf16>, vector<8x256xf32> -> vector<8x256xf32>
    %151 = arith.addf %148, %150 : vector<8x256xf32>
    %152 = vector.extract_strided_slice %151 {offsets = [0, 128], sizes = [8, 128], strides = [1, 1]} : vector<8x256xf32> to vector<8x128xf32>
    %153 = arith.negf %152 : vector<8x128xf32>
    %154 = math.exp %153 : vector<8x128xf32>
    %cst_56 = arith.constant 1.000000e+00 : f32
    %155 = vector.broadcast %cst_56 : f32 to vector<8x128xf32>
    %156 = arith.addf %155, %154 : vector<8x128xf32>
    %157 = arith.divf %155, %156 : vector<8x128xf32>
    %158 = vector.extract_strided_slice %151 {offsets = [0, 0], sizes = [8, 128], strides = [1, 1]} : vector<8x256xf32> to vector<8x128xf32>
    %cst_57 = arith.constant 0.000000e+00 : f32
    %159 = vector.broadcast %cst_57 : f32 to vector<8x128xf32>
    %160 = arith.maximumf %158, %159 : vector<8x128xf32>
    %cst_58 = arith.constant 1.000000e+00 : f32
    %161 = vector.broadcast %cst_58 : f32 to vector<8x128xf32>
    %162 = arith.subf %161, %157 : vector<8x128xf32>
    %163 = arith.subf %160, %138 : vector<8x128xf32>
    %164 = arith.mulf %162, %163 : vector<8x128xf32>
    %165 = arith.addf %138, %164 : vector<8x128xf32>
    %c5_59 = arith.constant 5 : index
    %c0_60 = arith.constant 0 : index
    %c0_61 = arith.constant 0 : index
    %166 = vector.load %arg7[%c5_59, %c0_60, %c0_61] : memref<8x8x128xf32, #tpu.memory_space<vmem>>, vector<1x8x128xf32>
    %167 = vector.shape_cast %166 : vector<1x8x128xf32> to vector<8x128xf32>
    %168 = vector.shape_cast %165 : vector<8x128xf32> to vector<1x8x128xf32>
    tpu.vector_store %arg7[%c5_59, %c0_60, %c0_61], %168 {strides = array<i32>} : memref<8x8x128xf32, #tpu.memory_space<vmem>>, vector<1x8x128xf32>,
    %c6 = arith.constant 6 : index
    %c0_62 = arith.constant 0 : index
    %c0_63 = arith.constant 0 : index
    %169 = vector.load %arg3[%c6, %c0_62, %c0_63] : memref<8x8x256xbf16, #tpu.memory_space<vmem>>, vector<1x8x256xbf16>
    %170 = vector.shape_cast %169 : vector<1x8x256xbf16> to vector<8x256xbf16>
    %171 = arith.extf %170 : vector<8x256xbf16> to vector<8x256xf32>
    %172 = vector.broadcast %3 : vector<1x256xf32> to vector<8x256xf32>
    %173 = arith.mulf %171, %172 : vector<8x256xf32>
    %174 = vector.broadcast %4 : vector<1x256xf32> to vector<8x256xf32>
    %175 = arith.addf %173, %174 : vector<8x256xf32>
    %176 = arith.truncf %165 : vector<8x128xf32> to vector<8x128xbf16>
    %cst_64 = arith.constant dense<0.000000e+00> : vector<8x256xf32>
    %177 = tpu.matmul %176, %5, %cst_64 {dimension_numbers = #tpu.dot_dimension_numbers<[1], [0], [0], [1], [0, 0, 1, 1], [], []>} : vector<8x128xbf16>, vector<128x256xbf16>, vector<8x256xf32> -> vector<8x256xf32>
    %178 = arith.addf %175, %177 : vector<8x256xf32>
    %179 = vector.extract_strided_slice %178 {offsets = [0, 128], sizes = [8, 128], strides = [1, 1]} : vector<8x256xf32> to vector<8x128xf32>
    %180 = arith.negf %179 : vector<8x128xf32>
    %181 = math.exp %180 : vector<8x128xf32>
    %cst_65 = arith.constant 1.000000e+00 : f32
    %182 = vector.broadcast %cst_65 : f32 to vector<8x128xf32>
    %183 = arith.addf %182, %181 : vector<8x128xf32>
    %184 = arith.divf %182, %183 : vector<8x128xf32>
    %185 = vector.extract_strided_slice %178 {offsets = [0, 0], sizes = [8, 128], strides = [1, 1]} : vector<8x256xf32> to vector<8x128xf32>
    %cst_66 = arith.constant 0.000000e+00 : f32
    %186 = vector.broadcast %cst_66 : f32 to vector<8x128xf32>
    %187 = arith.maximumf %185, %186 : vector<8x128xf32>
    %cst_67 = arith.constant 1.000000e+00 : f32
    %188 = vector.broadcast %cst_67 : f32 to vector<8x128xf32>
    %189 = arith.subf %188, %184 : vector<8x128xf32>
    %190 = arith.subf %187, %165 : vector<8x128xf32>
    %191 = arith.mulf %189, %190 : vector<8x128xf32>
    %192 = arith.addf %165, %191 : vector<8x128xf32>
    %c6_68 = arith.constant 6 : index
    %c0_69 = arith.constant 0 : index
    %c0_70 = arith.constant 0 : index
    %193 = vector.load %arg7[%c6_68, %c0_69, %c0_70] : memref<8x8x128xf32, #tpu.memory_space<vmem>>, vector<1x8x128xf32>
    %194 = vector.shape_cast %193 : vector<1x8x128xf32> to vector<8x128xf32>
    %195 = vector.shape_cast %192 : vector<8x128xf32> to vector<1x8x128xf32>
    tpu.vector_store %arg7[%c6_68, %c0_69, %c0_70], %195 {strides = array<i32>} : memref<8x8x128xf32, #tpu.memory_space<vmem>>, vector<1x8x128xf32>,
    %c7 = arith.constant 7 : index
    %c0_71 = arith.constant 0 : index
    %c0_72 = arith.constant 0 : index
    %196 = vector.load %arg3[%c7, %c0_71, %c0_72] : memref<8x8x256xbf16, #tpu.memory_space<vmem>>, vector<1x8x256xbf16>
    %197 = vector.shape_cast %196 : vector<1x8x256xbf16> to vector<8x256xbf16>
    %198 = arith.extf %197 : vector<8x256xbf16> to vector<8x256xf32>
    %199 = vector.broadcast %3 : vector<1x256xf32> to vector<8x256xf32>
    %200 = arith.mulf %198, %199 : vector<8x256xf32>
    %201 = vector.broadcast %4 : vector<1x256xf32> to vector<8x256xf32>
    %202 = arith.addf %200, %201 : vector<8x256xf32>
    %203 = arith.truncf %192 : vector<8x128xf32> to vector<8x128xbf16>
    %cst_73 = arith.constant dense<0.000000e+00> : vector<8x256xf32>
    %204 = tpu.matmul %203, %5, %cst_73 {dimension_numbers = #tpu.dot_dimension_numbers<[1], [0], [0], [1], [0, 0, 1, 1], [], []>} : vector<8x128xbf16>, vector<128x256xbf16>, vector<8x256xf32> -> vector<8x256xf32>
    %205 = arith.addf %202, %204 : vector<8x256xf32>
    %206 = vector.extract_strided_slice %205 {offsets = [0, 128], sizes = [8, 128], strides = [1, 1]} : vector<8x256xf32> to vector<8x128xf32>
    %207 = arith.negf %206 : vector<8x128xf32>
    %208 = math.exp %207 : vector<8x128xf32>
    %cst_74 = arith.constant 1.000000e+00 : f32
    %209 = vector.broadcast %cst_74 : f32 to vector<8x128xf32>
    %210 = arith.addf %209, %208 : vector<8x128xf32>
    %211 = arith.divf %209, %210 : vector<8x128xf32>
    %212 = vector.extract_strided_slice %205 {offsets = [0, 0], sizes = [8, 128], strides = [1, 1]} : vector<8x256xf32> to vector<8x128xf32>
    %cst_75 = arith.constant 0.000000e+00 : f32
    %213 = vector.broadcast %cst_75 : f32 to vector<8x128xf32>
    %214 = arith.maximumf %212, %213 : vector<8x128xf32>
    %cst_76 = arith.constant 1.000000e+00 : f32
    %215 = vector.broadcast %cst_76 : f32 to vector<8x128xf32>
    %216 = arith.subf %215, %211 : vector<8x128xf32>
    %217 = arith.subf %214, %192 : vector<8x128xf32>
    %218 = arith.mulf %216, %217 : vector<8x128xf32>
    %219 = arith.addf %192, %218 : vector<8x128xf32>
    %c7_77 = arith.constant 7 : index
    %c0_78 = arith.constant 0 : index
    %c0_79 = arith.constant 0 : index
    %220 = vector.load %arg7[%c7_77, %c0_78, %c0_79] : memref<8x8x128xf32, #tpu.memory_space<vmem>>, vector<1x8x128xf32>
    %221 = vector.shape_cast %220 : vector<1x8x128xf32> to vector<8x128xf32>
    %222 = vector.shape_cast %219 : vector<8x128xf32> to vector<1x8x128xf32>
    tpu.vector_store %arg7[%c7_77, %c0_78, %c0_79], %222 {strides = array<i32>} : memref<8x8x128xf32, #tpu.memory_space<vmem>>, vector<1x8x128xf32>,
    %c0_80 = arith.constant 0 : index
    %c0_81 = arith.constant 0 : index
    %223 = vector.load %arg8[%c0_80, %c0_81] : memref<8x128xf32, #tpu.memory_space<vmem>>, vector<8x128xf32>
    tpu.vector_store %arg8[%c0_80, %c0_81], %219 {strides = array<i32>} : memref<8x128xf32, #tpu.memory_space<vmem>>, vector<8x128xf32>,
    return
  }
  func.func @transform_0(%arg0: i32, %arg1: i32) -> (i32, i32) {
    %c0_i32 = arith.constant 0 : i32
    %c0_i32_0 = arith.constant 0 : i32
    return %arg0, %c0_i32 : i32, i32
  }
  func.func @transform_1(%arg0: i32, %arg1: i32) -> (i32, i32, i32) {
    %c0_i32 = arith.constant 0 : i32
    %c0_i32_0 = arith.constant 0 : i32
    return %arg1, %arg0, %c0_i32 : i32, i32, i32
  }
  func.func @transform_2(%arg0: i32, %arg1: i32) -> (i32, i32) {
    %c0_i32 = arith.constant 0 : i32
    %c0_i32_0 = arith.constant 0 : i32
    %c0_i32_1 = arith.constant 0 : i32
    return %c0_i32, %c0_i32_0 : i32, i32
  }
  func.func @transform_3(%arg0: i32, %arg1: i32) -> (i32, i32) {
    %c0_i32 = arith.constant 0 : i32
    %c0_i32_0 = arith.constant 0 : i32
    %c0_i32_1 = arith.constant 0 : i32
    return %c0_i32, %c0_i32_0 : i32, i32
  }
  func.func @transform_4(%arg0: i32, %arg1: i32) -> (i32, i32) {
    %c0_i32 = arith.constant 0 : i32
    %c0_i32_0 = arith.constant 0 : i32
    %c0_i32_1 = arith.constant 0 : i32
    return %c0_i32, %c0_i32_0 : i32, i32
  }
  func.func @transform_5(%arg0: i32, %arg1: i32) -> (i32, i32, i32) {
    %c0_i32 = arith.constant 0 : i32
    %c0_i32_0 = arith.constant 0 : i32
    return %arg1, %arg0, %c0_i32 : i32, i32, i32
  }
}

</mosaic_0001>

<bundles_post_ra>
// kernel: ligru_layer_forward.2
= control target key start
LH: loop header
LB: loop body
LE: loop exit
PB: predicated region body
PF: predicated region fallthrough
CT: control target
= control target key end

     0   :  { %v583_v1 = vmov 0   ;;  %vm83_vm0 = vcmask 130048   ;;  %v337_v11 = vlaneseq  ;;  %v584_v13 = vmov 0.0   ;;  %s813_s1 = inlined_call_operand.vmem [shape: bf16[16,256], index: 1, kind: input, shape index: {}]   ;;  %s814_s0 = inlined_call_operand.vmem [shape: bf16[128,16], index: 0, kind: input, shape index: {}]   ;;  %s815_s3 = inlined_call_operand.vmem [shape: f32[1,256], index: 3, kind: output, shape index: {1}]   ;;  %s816_s4 = inlined_call_operand.vmem [shape: f32[1,256], index: 4, kind: output, shape index: {2}]   ;;  %s817_s2 = inlined_call_operand.vmem [shape: bf16[128,256], index: 2, kind: output, shape index: {0}]  }
   0x1   :  { %v572_v0 = vld [vmem:[%s813_s1 + $0x4] ss:$8 sps:$4 sm:$0xff]   ;;  %140 = vmatprep.mubr.bf16.mxu0 %v583_v1  ;;  %180 = vmatprep.mubr.bf16.mxu1 %v583_v1  ;;  %v574_v2 = vld [vmem:[%s813_s1] ss:$8 sps:$4 sm:$0xff]   ;;  %v578_v7 = vld [vmem:[%s814_s0 + $0x10] sm:$0xff]  }
   0x2   :  { %122 = vmatprep.subr.bf16.mxu0 %v572_v0  ;;  %v575_v3 = vld [vmem:[%s814_s0] sm:$0xff]   ;;  %567 = vmatprep.subr.bf16.mxu1 %v572_v0  ;;  %v576_v5 = vld [vmem:[%s814_s0 + $0x8] sm:$0xff]   ;;  %v581_v8 = vld [vmem:[%s814_s0 + $0x30] sm:$0xff]   ;;  %vm650_vm1 = vcmp.lt.s32.totalorder %v337_v11, 256 }
   0x3   :  { %123 = vmatpush1.bf16.msra.mxu0 %v574_v2  ;;  %568 = vmatpush1.bf16.msra.mxu1 %v574_v2  ;;  %v577_v4 = vld [vmem:[%s814_s0 + $0x20] sm:$0xff]   ;;  %v579_v6 = vld [vmem:[%s814_s0 + $0x28] sm:$0xff]   ;;  %v580_v9 = vld [vmem:[%s814_s0 + $0x18] sm:$0xff]   ;;  %341 = vst.msk [vmem:[%s815_s3] sm:$0x3] %vm650_vm1, %v584_v13 }
   0x4   :  { %v582_v10 = vld [vmem:[%s814_s0 + $0x38] sm:$0xff]   ;;  %342 = vst.msk [vmem:[%s816_s4] sm:$0x3] %vm650_vm1, %v584_v13 }
   0x6   :  { %527 = vmatmul.mubr.msk.bf16.vlgmr.msra.gmra.mxu0 %vm83_vm0, %v575_v3  ;;  %531 = vmatmul.mubr.msk.bf16.vlgmr.msra.gmra.mxu1 %vm83_vm0, %v577_v4 }
   0x7   :  { %150 = vmatprep.mubr.bf16.mxu0 %v583_v1  ;;  %190 = vmatprep.mubr.bf16.mxu1 %v583_v1 }
   0xe   :  { %528 = vmatmul.mubr.msk.bf16.gmra.mxu0 %vm83_vm0, %v576_v5  ;;  %532 = vmatmul.mubr.msk.bf16.gmra.mxu1 %vm83_vm0, %v579_v6 }
   0xf   :  { %160 = vmatprep.mubr.bf16.mxu0 %v583_v1  ;;  %200 = vmatprep.mubr.bf16.mxu1 %v583_v1 }
  0x16   :  { %529 = vmatmul.mubr.msk.bf16.gmra.mxu0 %vm83_vm0, %v578_v7  ;;  %533 = vmatmul.mubr.msk.bf16.gmra.mxu1 %vm83_vm0, %v581_v8 }
  0x17   :  { %170 = vmatprep.mubr.bf16.mxu0 %v583_v1  ;;  %210 = vmatprep.mubr.bf16.mxu1 %v583_v1 }
  0x1e   :  { %530 = vmatmul.mubr.msk.bf16.gmra.mxu0 %vm83_vm0, %v580_v9  ;;  %534 = vmatmul.mubr.msk.bf16.gmra.mxu1 %vm83_vm0, %v582_v10 }
  0xc6   :  { %v142_v14 = vpop.f32.mrf.mxu0  ;;  %v664_v15 = vpop.f32.mrf.mxu1 }
  0xc7   :  { %v411_v38 = vmul.f32 %v142_v14, %v142_v14 }
  0xc8   :  { %v144_v16 = vpop.f32.mrf.mxu0  ;;  %v666_v17 = vpop.f32.mrf.mxu1 }
  0xc9   :  { %v551_v18 = vpack.c.bf16 %v144_v16, %v142_v14  ;;  %v559_v19 = vpack.c.bf16 %v666_v17, %v664_v15  ;;  %v412_v52 = vmul.f32 %v144_v16, %v144_v16 }
  0xca   :  { %v146_v20 = vpop.f32.mrf.mxu0  ;;  %v670_v21 = vpop.f32.mrf.mxu1 }
  0xcb   :  { %317 = vst [vmem:[%s817_s2] sm:$0xff] %v551_v18  ;;  %325 = vst [vmem:[%s817_s2 + $0x40] sm:$0xff] %v559_v19  ;;  %v413_v34 = vmul.f32 %v146_v20, %v146_v20  ;;  %v344_v43 = vadd.f32 %v146_v20, %v142_v14 }
  0xcc   :  { %v148_v22 = vpop.f32.mrf.mxu0  ;;  %v678_v23 = vpop.f32.mrf.mxu1 }
  0xcd   :  { %v552_v24 = vpack.c.bf16 %v148_v22, %v146_v20  ;;  %v560_v26 = vpack.c.bf16 %v678_v23, %v670_v21  ;;  %v443_v44 = vadd.f32 %v413_v34, %v411_v38  ;;  %v414_v45 = vmul.f32 %v148_v22, %v148_v22 }
  0xce   :  { %v152_v25 = vpop.f32.mrf.mxu0  ;;  %v682_v27 = vpop.f32.mrf.mxu1  ;;  %v365_v49 = vadd.f32 %v148_v22, %v144_v16 }
  0xcf   :  { %318 = vst [vmem:[%s817_s2 + $0x8] sm:$0xff] %v552_v24  ;;  %326 = vst [vmem:[%s817_s2 + $0x48] sm:$0xff] %v560_v26  ;;  %v415_v39 = vmul.f32 %v152_v25, %v152_v25  ;;  %v345_v50 = vadd.f32 %v344_v43, %v152_v25  ;;  %v464_v61 = vadd.f32 %v414_v45, %v412_v52 }
  0xd0   :  { %v154_v28 = vpop.f32.mrf.mxu0  ;;  %v690_v29 = vpop.f32.mrf.mxu1  ;;  %v427_v43 = vmul.f32 %v664_v15, %v664_v15 }
  0xd1   :  { %v553_v30 = vpack.c.bf16 %v154_v28, %v152_v25  ;;  %v561_v32 = vpack.c.bf16 %v690_v29, %v682_v27  ;;  %v444_v53 = vadd.f32 %v443_v44, %v415_v39  ;;  %v416_v54 = vmul.f32 %v154_v28, %v154_v28 }
  0xd2   :  { %v156_v31 = vpop.f32.mrf.mxu0  ;;  %v694_v33 = vpop.f32.mrf.mxu1  ;;  %v366_v58 = vadd.f32 %v365_v49, %v154_v28 }
  0xd3   :  { %319 = vst [vmem:[%s817_s2 + $0x10] sm:$0xff] %v553_v30  ;;  %327 = vst [vmem:[%s817_s2 + $0x50] sm:$0xff] %v561_v32  ;;  %v417_v46 = vmul.f32 %v156_v31, %v156_v31  ;;  %v346_v59 = vadd.f32 %v345_v50, %v156_v31  ;;  %v465_v6 = vadd.f32 %v464_v61, %v416_v54 }
  0xd4   :  { %v158_v35 = vpop.f32.mrf.mxu0  ;;  %v702_v36 = vpop.f32.mrf.mxu1  ;;  %v431_v61 = vmul.f32 %v682_v27, %v682_v27 }
  0xd5   :  { %v554_v37 = vpack.c.bf16 %v158_v35, %v156_v31  ;;  %v562_v41 = vpack.c.bf16 %v702_v36, %v694_v33  ;;  %v445_v62 = vadd.f32 %v444_v53, %v417_v46  ;;  %v418_v63 = vmul.f32 %v158_v35, %v158_v35 }
  0xd6   :  { %v162_v40 = vpop.f32.mrf.mxu0  ;;  %v706_v42 = vpop.f32.mrf.mxu1  ;;  %v367_v2 = vadd.f32 %v366_v58, %v158_v35 }
  0xd7   :  { %320 = vst [vmem:[%s817_s2 + $0x18] sm:$0xff] %v554_v37  ;;  %328 = vst [vmem:[%s817_s2 + $0x58] sm:$0xff] %v562_v41  ;;  %v419_v60 = vmul.f32 %v162_v40, %v162_v40  ;;  %v347_v3 = vadd.f32 %v346_v59, %v162_v40  ;;  %v466_v19 = vadd.f32 %v465_v6, %v418_v63 }
  0xd8   :  { %v164_v47 = vpop.f32.mrf.mxu0  ;;  %v714_v48 = vpop.f32.mrf.mxu1  ;;  %v432_v6 = vmul.f32 %v690_v29, %v690_v29 }
  0xd9   :  { %v555_v51 = vpack.c.bf16 %v164_v47, %v162_v40  ;;  %v563_v56 = vpack.c.bf16 %v714_v48, %v706_v42  ;;  %v420_v7 = vmul.f32 %v164_v47, %v164_v47  ;;  %v446_v13 = vadd.f32 %v445_v62, %v419_v60 }
  0xda   :  { %v166_v55 = vpop.f32.mrf.mxu0  ;;  %v718_v57 = vpop.f32.mrf.mxu1  ;;  %v368_v14 = vadd.f32 %v367_v2, %v164_v47 }
  0xdb   :  { %321 = vst [vmem:[%s817_s2 + $0x20] sm:$0xff] %v555_v51  ;;  %329 = vst [vmem:[%s817_s2 + $0x60] sm:$0xff] %v563_v56  ;;  %v421_v4 = vmul.f32 %v166_v55, %v166_v55  ;;  %v348_v16 = vadd.f32 %v347_v3, %v166_v55  ;;  %v467_v31 = vadd.f32 %v466_v19, %v420_v7 }
  0xdc   :  { %v168_v0 = vpop.f32.mrf.mxu0  ;;  %v726_v1 = vpop.f32.mrf.mxu1  ;;  %v436_v19 = vmul.f32 %v714_v48, %v714_v48 }
  0xdd   :  { %v556_v5 = vpack.c.bf16 %v168_v0, %v166_v55  ;;  %v564_v9 = vpack.c.bf16 %v726_v1, %v718_v57  ;;  %v422_v20 = vmul.f32 %v168_v0, %v168_v0  ;;  %v447_v25 = vadd.f32 %v446_v13, %v421_v4 }
  0xde   :  { %v172_v8 = vpop.f32.mrf.mxu0  ;;  %v730_v10 = vpop.f32.mrf.mxu1  ;;  %v369_v26 = vadd.f32 %v368_v14, %v168_v0  ;;  %v429_v55 = vmul.f32 %v670_v21, %v670_v21  ;;  %v430_v0 = vmul.f32 %v678_v23, %v678_v23  ;;  %v434_v13 = vmul.f32 %v702_v36, %v702_v36 }
  0xdf   :  { %322 = vst [vmem:[%s817_s2 + $0x28] sm:$0xff] %v556_v5  ;;  %v423_v18 = vmul.f32 %v172_v8, %v172_v8  ;;  %330 = vst [vmem:[%s817_s2 + $0x68] sm:$0xff] %v564_v9  ;;  %v349_v28 = vadd.f32 %v348_v16, %v172_v8  ;;  %v468_v44 = vadd.f32 %v467_v31, %v422_v20 }
  0xe0   :  { %v174_v22 = vpop.f32.mrf.mxu0  ;;  %v738_v24 = vpop.f32.mrf.mxu1 }
  0xe1   :  { %v557_v30 = vpack.c.bf16 %v174_v22, %v172_v8  ;;  %v424_v32 = vmul.f32 %v174_v22, %v174_v22  ;;  %v565_v35 = vpack.c.bf16 %v738_v24, %v730_v10  ;;  %v448_v38 = vadd.f32 %v447_v25, %v423_v18 }
  0xe2   :  { %v176_v34 = vpop.f32.mrf.mxu0  ;;  %v216_v37 = vpop.f32.mrf.mxu1  ;;  %v370_v39 = vadd.f32 %v369_v26, %v174_v22  ;;  %v435_v8 = vmul.f32 %v706_v42, %v706_v42  ;;  %v438_v26 = vmul.f32 %v726_v1, %v726_v1 }
  0xe3   :  { %323 = vst [vmem:[%s817_s2 + $0x30] sm:$0xff] %v557_v30  ;;  %v350_v40 = vadd.f32 %v349_v28, %v176_v34  ;;  %v425_v41 = vmul.f32 %v176_v34, %v176_v34  ;;  %331 = vst [vmem:[%s817_s2 + $0x70] sm:$0xff] %v565_v35  ;;  %v469_v52 = vadd.f32 %v468_v44, %v424_v32 }
  0xe4   :  { %v178_v45 = vpop.f32.mrf.mxu0  ;;  %v218_v46 = vpop.f32.mrf.mxu1  ;;  %v441_v32 = vmul.f32 %v216_v37, %v216_v37 }
  0xe5   :  { %v351_v47 = vadd.f32 %v350_v40, %v664_v15  ;;  %v449_v49 = vadd.f32 %v448_v38, %v425_v41  ;;  %v558_v50 = vpack.c.bf16 %v178_v45, %v176_v34  ;;  %v371_v51 = vadd.f32 %v370_v39, %v178_v45 }
  0xe6   :  { %v426_v53 = vmul.f32 %v178_v45, %v178_v45  ;;  %v566_v54 = vpack.c.bf16 %v218_v46, %v216_v37  ;;  %v428_v15 = vmul.f32 %v666_v17, %v666_v17  ;;  %v442_v41 = vmul.f32 %v218_v46, %v218_v46 }
  0xe7   :  { %v352_v56 = vadd.f32 %v351_v47, %v670_v21  ;;  %v450_v58 = vadd.f32 %v449_v49, %v427_v43  ;;  %324 = vst [vmem:[%s817_s2 + $0x38] sm:$0xff] %v558_v50  ;;  %v372_v59 = vadd.f32 %v371_v51, %v666_v17  ;;  %v433_v17 = vmul.f32 %v694_v33, %v694_v33 }
  0xe8   :  { %v470_v60 = vadd.f32 %v469_v52, %v426_v53  ;;  %332 = vst [vmem:[%s817_s2 + $0x78] sm:$0xff] %v566_v54  ;;  %v585_v45 = vmov 1966171168  }
  0xe9   :  { %v451_v62 = vadd.f32 %v450_v58, %v429_v55  ;;  %v373_v21 = vadd.f32 %v372_v59, %v678_v23  ;;  %v353_v63 = vadd.f32 %v352_v56, %v682_v27 }
  0xea   :  { %v471_v2 = vadd.f32 %v470_v60, %v428_v15 }
  0xeb   :  { %v374_v3 = vadd.f32 %v373_v21, %v690_v29  ;;  %v354_v4 = vadd.f32 %v353_v63, %v694_v33  ;;  %v452_v5 = vadd.f32 %v451_v62, %v431_v61  ;;  %v437_v33 = vmul.f32 %v718_v57, %v718_v57 }
  0xec   :  { %v472_v7 = vadd.f32 %v471_v2, %v430_v0 }
  0xed   :  { %v355_v27 = vadd.f32 %v354_v4, %v706_v42  ;;  %v453_v9 = vadd.f32 %v452_v5, %v433_v17  ;;  %v375_v23 = vadd.f32 %v374_v3, %v702_v36  ;;  %v439_v36 = vmul.f32 %v730_v10, %v730_v10 }
  0xee   :  { %v473_v14 = vadd.f32 %v472_v7, %v432_v6  ;;  %v343_v6 = vld [vmem:[%s815_s3] sm:$0x3] }
  0xef   :  { %v356_v16 = vadd.f32 %v355_v27, %v718_v57  ;;  %v454_v18 = vadd.f32 %v453_v9, %v435_v8  ;;  %v376_v29 = vadd.f32 %v375_v23, %v714_v48  ;;  %v440_v48 = vmul.f32 %v738_v24, %v738_v24  ;;  %v410_v9 = vld [vmem:[%s816_s4] sm:$0x3] }
  0xf0   :  { %v474_v20 = vadd.f32 %v473_v14, %v434_v13 }
  0xf1   :  { %v455_v42 = vadd.f32 %v454_v18, %v437_v33  ;;  %v377_v22 = vadd.f32 %v376_v29, %v726_v1  ;;  %v357_v25 = vadd.f32 %v356_v16, %v730_v10  ;;  %v390_v1 = vunpack.c.l.s4 %v585_v45 }
  0xf2   :  { %v475_v28 = vadd.f32 %v474_v20, %v436_v19 }
  0xf3   :  { %v456_v57 = vadd.f32 %v455_v42, %v439_v36  ;;  %v378_v30 = vadd.f32 %v377_v22, %v738_v24  ;;  %v358_v31 = vadd.f32 %v357_v25, %v216_v37  ;;  %v391_v55 = vunpack.c.0.s8 %v390_v1 }
  0xf4   :  { %v476_v34 = vadd.f32 %v475_v28, %v438_v26 }
  0xf5   :  { %v359_v35 = vrot.slane %v358_v31, 4  ;;  %v457_v38 = vadd.f32 %v456_v57, %v441_v32  ;;  %v379_v39 = vadd.f32 %v378_v30, %v218_v46  ;;  %v393_v46 = vshrl.u32 %v337_v11, 7 }
  0xf6   :  { %v477_v40 = vadd.f32 %v476_v34, %v440_v48 }
  0xf7   :  { %v360_v43 = vadd.f32 %v359_v35, %v358_v31  ;;  %v458_v10 = vrot.slane %v457_v38, 4  ;;  %v380_v44 = vrot.slane %v379_v39, 4  ;;  %v394_v0 = vsub.s32 %v391_v55, %v393_v46 }
  0xf8   :  { %v478_v47 = vadd.f32 %v477_v40, %v442_v41 }
  0xf9   :  { %v361_v49 = vrot.slane %v360_v43, 2  ;;  %v459_v50 = vadd.f32 %v458_v10, %v457_v38  ;;  %v381_v51 = vadd.f32 %v380_v44, %v379_v39 }
  0xfa   :  { %v479_v52 = vrot.slane %v478_v47, 4 }
  0xfb   :  { %v362_v37 = vadd.f32 %v361_v49, %v360_v43  ;;  %v460_v53 = vrot.slane %v459_v50, 2  ;;  %v382_v54 = vrot.slane %v381_v51, 2 }
  0xfc   :  { %v480_v24 = vadd.f32 %v479_v52, %v478_v47 }
  0xfd   :  { %v363_v56 = vrot.slane %v362_v37, 1  ;;  %v461_v58 = vadd.f32 %v460_v53, %v459_v50  ;;  %v383_v59 = vadd.f32 %v382_v54, %v381_v51 }
  0xfe   :  { %v481_v15 = vrot.slane %v480_v24, 2 }
  0xff   :  { %v384_v60 = vrot.slane %v383_v59, 1  ;;  %v462_v61 = vrot.slane %v461_v58, 1  ;;  %v364_v21 = vadd.f32 %v363_v56, %v362_v37 }
 0x100   :  { %v482_v62 = vadd.f32 %v481_v15, %v480_v24 }
 0x101   :  { %v385_v63 = vadd.f32 %v384_v60, %v383_v59  ;;  %v463_v3 = vadd.f32 %v462_v61, %v461_v58 }
 0x102   :  { %v483_v2 = vrot.slane %v482_v62, 1 }
 0x103   :  { %v388_v17 = vcombine.low %v364_v21, %v385_v63 }
 0x104   :  { %v484_v4 = vadd.f32 %v483_v2, %v482_v62 }
 0x105   :  { %v395_v5 = vrot.slane %v388_v17, %v394_v0 }
 0x106   :  { %v487_v7 = vcombine.low %v463_v3, %v484_v4 }
 0x107   :  { %v402_v8 = vrot.slane %v395_v5, %v394_v0 }
 0x108   :  { %v494_v27 = vrot.slane %v487_v7, %v394_v0 }
 0x109   :  { %v404_v11 = vadd.f32 %v402_v8, %v343_v6 }
 0x10a   :  { %v501_v23 = vrot.slane %v494_v27, %v394_v0 }
 0x10b   :  { %409 = vst.msk [vmem:[%s815_s3] sm:$0x3] %vm650_vm1, %v404_v11 }
 0x10c   :  { %v503_v13 = vadd.f32 %v501_v23, %v410_v9 }
 0x10e   :  { %504 = vst.msk [vmem:[%s816_s4] sm:$0x3] %vm650_vm1, %v503_v13 }

// kernel: ligru_layer_forward.3
= control target key start
LH: loop header
LB: loop body
LE: loop exit
PB: predicated region body
PF: predicated region fallthrough
CT: control target
= control target key end

     0   :  { %s1217_s18 = smov 0   ;;  %s1219_s19 = smov 0   ;;  %s1535_s0 = inlined_call_operand.vmem [shape: f32[8,128], index: 0, kind: input, shape index: {}]   ;;  %s1536_s1 = inlined_call_operand.vmem [shape: bf16[16,8,256], index: 1, kind: input, shape index: {}]   ;;  %s1537_s2 = inlined_call_operand.vmem [shape: bf16[128,256], index: 2, kind: input, shape index: {}]   ;;  %s1538_s3 = inlined_call_operand.vmem [shape: f32[1,256], index: 3, kind: input, shape index: {}]   ;;  %s1539_s4 = inlined_call_operand.vmem [shape: f32[1,256], index: 4, kind: input, shape index: {}]   ;;  %s1540_s5 = inlined_call_operand.vmem [shape: f32[16,8,128], index: 5, kind: output, shape index: {}]  }
   0x1   :  { %s1221_s20 = smov 0  }
   0x2 LB: > { %s24_s21 = sadd.s32 1, %s1180_s19  ;;  %p1033_p0 = scmp.ge.s32.totalorder %s1184_s20, 1  ;;  %s1184_s20 = sphi %s1221_s20, %s15_s20   ;;  %s1180_s19 = sphi %s1219_s19, %s1542_s19   ;;  %s1176_s18 = sphi %s1217_s18, %s1541_s18  }
   0x3   : > { %p25_p1 = scmp.ge.s32.totalorder %s24_s21, 2  ;;  %p218_p2 = scmp.lt.s32.totalorder %s1184_s20, 3 }
   0x5   : > { %s1544_s21 = smov (%p25_p1, %s24_s21), 0  ;;  %p219_p3 = pnand %p1033_p0, %p218_p2 }
   0x6   : > { %s1034_s22 = sshll.u32 (!%p219_p3), %s1176_s18, 3  ;;  %p1039_p5 = scmp.ne.s32.totalorder (!%p219_p3), %s1176_s18, 0 }
   0x7   : > { %222 = sbr.rel (%p219_p3) target bundleno = 1948 (0x79c), region = 40  ;;  %p263_p4 = scmp.lt.s32.totalorder (!%p219_p3), %s1034_s22, 15 }
   0xc   : > { %s1546_s22 = smov (!%p263_p4, %s1034_s22), 15  ;;  %286 = sbr.rel (%p1039_p5) target bundleno = 19 (0x13), region = 44 }
   0xd   : > { %s1080_s23 = sshll.u32 %s1546_s22, 3 }
   0xe   : > { %s1238_s26 = scalar_lea.vmem %s1536_s1, %s1080_s23  ;;  %s1243_s29 = scalar_lea.vmem %s1540_s5, %s1080_s23 }
  0x11   : > { %v287_v0 = vld [vmem:[%s1535_s0] sm:$0xff] }
  0x12   : > { %288 = vst [vmem:[#allocation2] sm:$0xff] %v287_v0 }
  0x13 PF: > { %v1251_v1 = vld [vmem:[%s1537_s2 + $0x74] ss:$8 sps:$4 sm:$0xff]   ;;  %v1256_v2 = vld [vmem:[%s1537_s2 + $0x70] ss:$8 sps:$4 sm:$0xff]   ;;  %v1186_v3 = vmov 0   ;;  %v312_v20 = vlaneseq  ;;  %v308_v24 = vld [vmem:[%s1238_s26] sm:$0xff] }
  0x14   : > { %450 = vmatprep.mubr.bf16.mxu0 %v1186_v3  ;;  %514 = vmatprep.mubr.bf16.mxu1 %v1186_v3  ;;  %v1264_v4 = vld [vmem:[%s1537_s2 + $0x64] ss:$8 sps:$4 sm:$0xff]   ;;  %v1271_v5 = vld [vmem:[%s1537_s2 + $0x60] ss:$8 sps:$4 sm:$0xff]   ;;  %v1278_v6 = vld [vmem:[%s1537_s2 + $0x54] ss:$8 sps:$4 sm:$0xff]   ;;  %v310_v25 = vunpack.c.h.bf16 %v308_v24  ;;  %v309_v38 = vunpack.c.l.bf16 %v308_v24 }
  0x15   : > { %418 = vmatprep.subr.bf16.mxu0 %v1251_v1  ;;  %482 = vmatprep.subr.bf16.mxu1 %v1251_v1  ;;  %v1285_v7 = vld [vmem:[%s1537_s2 + $0x50] ss:$8 sps:$4 sm:$0xff]   ;;  %v1292_v8 = vld [vmem:[%s1537_s2 + $0x44] ss:$8 sps:$4 sm:$0xff]   ;;  %v1299_v9 = vld [vmem:[%s1537_s2 + $0x40] ss:$8 sps:$4 sm:$0xff]  }
  0x16   : > { %419 = vmatpush1.bf16.msra.mxu0 %v1256_v2  ;;  %483 = vmatpush1.bf16.msra.mxu1 %v1256_v2  ;;  %v1306_v10 = vld [vmem:[%s1537_s2 + $0x34] ss:$8 sps:$4 sm:$0xff]   ;;  %v1313_v11 = vld [vmem:[%s1537_s2 + $0x30] ss:$8 sps:$4 sm:$0xff]   ;;  %v1320_v12 = vld [vmem:[%s1537_s2 + $0x24] ss:$8 sps:$4 sm:$0xff]  }
  0x17   : > { %420 = vmatprep.subr.bf16.mxu0 %v1264_v4  ;;  %484 = vmatprep.subr.bf16.mxu1 %v1264_v4  ;;  %v1327_v13 = vld [vmem:[%s1537_s2 + $0x20] ss:$8 sps:$4 sm:$0xff]   ;;  %v1334_v14 = vld [vmem:[%s1537_s2 + $0x14] ss:$8 sps:$4 sm:$0xff]   ;;  %v1341_v15 = vld [vmem:[%s1537_s2 + $0x10] ss:$8 sps:$4 sm:$0xff]  }
  0x18   : > { %v1348_v16 = vld [vmem:[%s1537_s2 + $0x4] ss:$8 sps:$4 sm:$0xff]   ;;  %v1355_v17 = vld [vmem:[%s1537_s2] ss:$8 sps:$4 sm:$0xff]   ;;  %v313_v21 = vshrl.u32 %v312_v20, 7 }
  0x19   : > { %v307_v18 = vld [vmem:[#allocation2] sm:$0xff]  ;;  %v1057_v53 = vld [vmem:[%s1238_s26 + $0x8] sm:$0xff] }
  0x1a   : > { %421 = vmatpush1.bf16.msra.mxu0 %v1271_v5  ;;  %485 = vmatpush1.bf16.msra.mxu1 %v1271_v5  ;;  %v337_v19 = vpack.c.bf16 %v307_v18, %v307_v18  ;;  %v318_v22 = vsub.s32 1, %v313_v21  ;;  %v289_v23 = vld [vmem:[%s1538_s3] sm:$0x3]  ;;  %v314_v37 = vsub.s32 0, %v313_v21  ;;  %v476_v54 = vunpack.c.h.bf16 %v1057_v53 }
  0x1b   : > { %422 = vmatprep.subr.bf16.mxu0 %v1278_v6  ;;  %486 = vmatprep.subr.bf16.mxu1 %v1278_v6  ;;  %v290_v27 = vld [vmem:[%s1539_s4] sm:$0x3]  ;;  %v475_v63 = vunpack.c.l.bf16 %v1057_v53 }
  0x1c   : > { %v1385_v26 = vrot.slane %v289_v23, %v318_v22  ;;  %v1391_v29 = vrot.slane %v290_v27, %v318_v22  ;;  %v1394_v39 = vrot.slane %v289_v23, %v314_v37  ;;  %v1397_v42 = vrot.slane %v290_v27, %v314_v37 }
  0x1e   : > { %423 = vmatpush1.bf16.msra.mxu0 %v1285_v7  ;;  %487 = vmatpush1.bf16.msra.mxu1 %v1285_v7  ;;  %v323_v28 = vmul.f32 %v1385_v26, %v310_v25  ;;  %v322_v41 = vmul.f32 %v1394_v39, %v309_v38  ;;  %v478_v55 = vmul.f32 %v476_v54, %v1385_v26 }
  0x1f   : > { %424 = vmatprep.subr.bf16.mxu0 %v1292_v8  ;;  %488 = vmatprep.subr.bf16.mxu1 %v1292_v8 }
  0x20   : > { %v336_v30 = vadd.f32 %v1391_v29, %v323_v28  ;;  %v335_v44 = vadd.f32 %v1397_v42, %v322_v41  ;;  %v480_v56 = vadd.f32 %v478_v55, %v1391_v29 }
  0x22   : > { %425 = vmatpush1.bf16.msra.mxu0 %v1299_v9  ;;  %489 = vmatpush1.bf16.msra.mxu1 %v1299_v9 }
  0x23   : > { %426 = vmatprep.subr.bf16.mxu0 %v1306_v10  ;;  %490 = vmatprep.subr.bf16.mxu1 %v1306_v10 }
  0x26   : > { %427 = vmatpush1.bf16.msra.mxu0 %v1313_v11  ;;  %491 = vmatpush1.bf16.msra.mxu1 %v1313_v11 }
  0x27   : > { %428 = vmatprep.subr.bf16.mxu0 %v1320_v12  ;;  %492 = vmatprep.subr.bf16.mxu1 %v1320_v12 }
  0x2a   : > { %429 = vmatpush1.bf16.msra.mxu0 %v1327_v13  ;;  %493 = vmatpush1.bf16.msra.mxu1 %v1327_v13 }
  0x2b   : > { %430 = vmatprep.subr.bf16.mxu0 %v1334_v14  ;;  %494 = vmatprep.subr.bf16.mxu1 %v1334_v14 }
  0x2e   : > { %431 = vmatpush1.bf16.msra.mxu0 %v1341_v15  ;;  %495 = vmatpush1.bf16.msra.mxu1 %v1341_v15 }
  0x2f   : > { %432 = vmatprep.subr.bf16.mxu0 %v1348_v16  ;;  %496 = vmatprep.subr.bf16.mxu1 %v1348_v16 }
  0x32   : > { %433 = vmatpush1.bf16.msra.mxu0 %v1355_v17  ;;  %497 = vmatpush1.bf16.msra.mxu1 %v1355_v17 }
  0x33   : > { %547 = vmatprep.subr.bf16.mxu0 %v1251_v1  ;;  %612 = vmatprep.subr.bf16.mxu1 %v1251_v1 }
  0x35   : > { %451 = vmatmul.mubr.bf16.vlgmr.msra.gmra.mxu0 %v337_v19 }
  0x36   : > { %548 = vmatpush1.bf16.msra.mxu0 %v1256_v2  ;;  %579 = vmatprep.mubr.bf16.mxu0 %v1186_v3 }
  0x37   : > { %549 = vmatprep.subr.bf16.mxu0 %v1264_v4 }
  0x3a   : > { %550 = vmatpush1.bf16.msra.mxu0 %v1271_v5 }
  0x3b   : > { %551 = vmatprep.subr.bf16.mxu0 %v1278_v6 }
  0x3e   : > { %552 = vmatpush1.bf16.msra.mxu0 %v1285_v7 }
  0x3f   : > { %553 = vmatprep.subr.bf16.mxu0 %v1292_v8 }
  0x42   : > { %554 = vmatpush1.bf16.msra.mxu0 %v1299_v9 }
  0x43   : > { %555 = vmatprep.subr.bf16.mxu0 %v1306_v10 }
  0x46   : > { %556 = vmatpush1.bf16.msra.mxu0 %v1313_v11 }
  0x47   : > { %557 = vmatprep.subr.bf16.mxu0 %v1320_v12 }
  0x4a   : > { %558 = vmatpush1.bf16.msra.mxu0 %v1327_v13 }
  0x4b   : > { %559 = vmatprep.subr.bf16.mxu0 %v1334_v14 }
  0x4e   : > { %560 = vmatpush1.bf16.msra.mxu0 %v1341_v15 }
  0x4f   : > { %561 = vmatprep.subr.bf16.mxu0 %v1348_v16 }
  0x52   : > { %562 = vmatpush1.bf16.msra.mxu0 %v1355_v17 }
  0x53   : > { %677 = vmatprep.subr.bf16.mxu0 %v1251_v1 }
  0xf5   : > { %v452_v31 = vpop.f32.mrf.mxu0 }
  0xf6   : > { %v459_v45 = vadd.f32 %v452_v31, %v335_v44  ;;  %v1060_v31 = vld [vmem:[%s1238_s26 + $0x10] sm:$0xff] }
  0xf7   : > { %v454_v32 = vpop.f32.mrf.mxu0 }
  0xf8   : > { %v460_v33 = vadd.f32 %v454_v32, %v336_v30  ;;  %v467_v46 = vmax.f32 %v459_v45, 0.0  ;;  %v541_v32 = vunpack.c.h.bf16 %v1060_v31 }
  0xf9   : > { %v456_v34 = vpop.f32.mrf.mxu0 }
  0xfa   : > { %v1056_v35 = vmul.f32 -1.442695, %v460_v33  ;;  %v469_v48 = vsub.f32 %v467_v46, %v307_v18  ;;  %v543_v33 = vmul.f32 %v541_v32, %v1385_v26 }
  0xfb   : > { %v457_v36 = vpop.f32.mrf.mxu0 }
  0xfc   : > { %1130 = vpow2.f32 %v1056_v35  ;;  %v545_v34 = vadd.f32 %v543_v33, %v1391_v29  ;;  %v1066_v33 = vld [vmem:[%s1238_s26 + $0x20] sm:$0xff] }
 0x109   : > { %v1131_v40 = vpop.eup %1130 }
 0x10a   : > { %v464_v43 = vadd.f32 1.0, %v1131_v40 }
 0x10c   : > { %1132 = vrcp.f32 %v464_v43  ;;  %v540_v43 = vunpack.c.l.bf16 %v1060_v31 }
 0x10e   : > { %v542_v45 = vmul.f32 %v540_v43, %v1394_v39 }
 0x119   : > { %v1133_v47 = vpop.eup %1132 }
 0x11a   : > { %v468_v49 = vsub.f32 1.0, %v1133_v47  ;;  %v544_v47 = vadd.f32 %v542_v45, %v1397_v42  ;;  %v670_v45 = vunpack.c.l.bf16 %v1066_v33 }
 0x11c   : > { %v470_v50 = vmul.f32 %v469_v48, %v468_v49 }
 0x11e   : > { %v471_v51 = vadd.f32 %v470_v50, %v307_v18  ;;  %v477_v18 = vmul.f32 %v475_v63, %v1394_v39 }
 0x120   : > { %472 = vst [vmem:[%s1243_s29] sm:$0xff] %v471_v51  ;;  %v481_v52 = vpack.c.bf16 %v471_v51, %v471_v51  ;;  %v479_v20 = vadd.f32 %v477_v18, %v1397_v42 }
 0x122   : > { %515 = vmatmul.mubr.bf16.vlgmr.msra.gmra.mxu1 %v481_v52 }
 0x123   : > { %613 = vmatpush1.bf16.msra.mxu1 %v1256_v2  ;;  %644 = vmatprep.mubr.bf16.mxu1 %v1186_v3 }
 0x124   : > { %614 = vmatprep.subr.bf16.mxu1 %v1264_v4 }
 0x127   : > { %615 = vmatpush1.bf16.msra.mxu1 %v1271_v5 }
 0x128   : > { %616 = vmatprep.subr.bf16.mxu1 %v1278_v6 }
 0x12b   : > { %617 = vmatpush1.bf16.msra.mxu1 %v1285_v7 }
 0x12c   : > { %618 = vmatprep.subr.bf16.mxu1 %v1292_v8 }
 0x12f   : > { %619 = vmatpush1.bf16.msra.mxu1 %v1299_v9 }
 0x130   : > { %620 = vmatprep.subr.bf16.mxu1 %v1306_v10 }
 0x133   : > { %621 = vmatpush1.bf16.msra.mxu1 %v1313_v11 }
 0x134   : > { %622 = vmatprep.subr.bf16.mxu1 %v1320_v12 }
 0x137   : > { %623 = vmatpush1.bf16.msra.mxu1 %v1327_v13 }
 0x138   : > { %624 = vmatprep.subr.bf16.mxu1 %v1334_v14 }
 0x13b   : > { %625 = vmatpush1.bf16.msra.mxu1 %v1341_v15 }
 0x13c   : > { %626 = vmatprep.subr.bf16.mxu1 %v1348_v16 }
 0x13f   : > { %627 = vmatpush1.bf16.msra.mxu1 %v1355_v17 }
 0x140   : > { %742 = vmatprep.subr.bf16.mxu1 %v1251_v1 }
 0x1e2   : > { %v516_v57 = vpop.f32.mrf.mxu1 }
 0x1e3   : > { %v523_v21 = vadd.f32 %v516_v57, %v479_v20 }
 0x1e4   : > { %v518_v58 = vpop.f32.mrf.mxu1 }
 0x1e5   : > { %v524_v59 = vadd.f32 %v518_v58, %v480_v56  ;;  %v531_v22 = vmax.f32 %v523_v21, 0.0  ;;  %v1063_v56 = vld [vmem:[%s1238_s26 + $0x18] sm:$0xff] }
 0x1e6   : > { %v520_v60 = vpop.f32.mrf.mxu1  ;;  %v606_v57 = vunpack.c.h.bf16 %v1063_v56 }
 0x1e7   : > { %v1058_v61 = vmul.f32 -1.442695, %v524_v59  ;;  %v533_v24 = vsub.f32 %v531_v22, %v471_v51 }
 0x1e8   : > { %v521_v62 = vpop.f32.mrf.mxu1  ;;  %v608_v58 = vmul.f32 %v606_v57, %v1385_v26 }
 0x1e9   : > { %1134 = vpow2.f32 %v1058_v61 }
 0x1ea   : > { %v610_v59 = vadd.f32 %v608_v58, %v1391_v29 }
 0x1f6   : > { %v1135_v0 = vpop.eup %1134 }
 0x1f7   : > { %v528_v19 = vadd.f32 1.0, %v1135_v0 }
 0x1f9   : > { %1136 = vrcp.f32 %v528_v19  ;;  %v605_v19 = vunpack.c.l.bf16 %v1063_v56 }
 0x1fb   : > { %v607_v21 = vmul.f32 %v605_v19, %v1394_v39 }
 0x206   : > { %v1137_v23 = vpop.eup %1136 }
 0x207   : > { %v532_v25 = vsub.f32 1.0, %v1137_v23 }
 0x209   : > { %v534_v27 = vmul.f32 %v533_v24, %v532_v25 }
 0x20b   : > { %v535_v28 = vadd.f32 %v534_v27, %v471_v51 }
 0x20d   : > { %1059 = vst [vmem:[%s1243_s29 + $0x8] sm:$0xff] %v535_v28  ;;  %v546_v30 = vpack.c.bf16 %v535_v28, %v535_v28 }
 0x20f   : > { %580 = vmatmul.mubr.bf16.vlgmr.msra.gmra.mxu0 %v546_v30 }
 0x210   : > { %678 = vmatpush1.bf16.msra.mxu0 %v1256_v2  ;;  %709 = vmatprep.mubr.bf16.mxu0 %v1186_v3 }
 0x211   : > { %679 = vmatprep.subr.bf16.mxu0 %v1264_v4 }
 0x214   : > { %680 = vmatpush1.bf16.msra.mxu0 %v1271_v5 }
 0x215   : > { %681 = vmatprep.subr.bf16.mxu0 %v1278_v6 }
 0x218   : > { %682 = vmatpush1.bf16.msra.mxu0 %v1285_v7 }
 0x219   : > { %683 = vmatprep.subr.bf16.mxu0 %v1292_v8 }
 0x21c   : > { %684 = vmatpush1.bf16.msra.mxu0 %v1299_v9 }
 0x21d   : > { %685 = vmatprep.subr.bf16.mxu0 %v1306_v10 }
 0x220   : > { %686 = vmatpush1.bf16.msra.mxu0 %v1313_v11 }
 0x221   : > { %687 = vmatprep.subr.bf16.mxu0 %v1320_v12 }
 0x224   : > { %688 = vmatpush1.bf16.msra.mxu0 %v1327_v13 }
 0x225   : > { %689 = vmatprep.subr.bf16.mxu0 %v1334_v14 }
 0x228   : > { %690 = vmatpush1.bf16.msra.mxu0 %v1341_v15 }
 0x229   : > { %691 = vmatprep.subr.bf16.mxu0 %v1348_v16 }
 0x22c   : > { %692 = vmatpush1.bf16.msra.mxu0 %v1355_v17 }
 0x22d   : > { %807 = vmatprep.subr.bf16.mxu0 %v1251_v1 }
 0x2cf   : > { %v581_v35 = vpop.f32.mrf.mxu0 }
 0x2d0   : > { %v588_v48 = vadd.f32 %v581_v35, %v544_v47  ;;  %v672_v47 = vmul.f32 %v670_v45, %v1394_v39 }
 0x2d1   : > { %v583_v36 = vpop.f32.mrf.mxu0 }
 0x2d2   : > { %v589_v37 = vadd.f32 %v583_v36, %v545_v34  ;;  %v596_v49 = vmax.f32 %v588_v48, 0.0  ;;  %v671_v34 = vunpack.c.h.bf16 %v1066_v33 }
 0x2d3   : > { %v585_v38 = vpop.f32.mrf.mxu0 }
 0x2d4   : > { %v1061_v40 = vmul.f32 -1.442695, %v589_v37  ;;  %v598_v51 = vsub.f32 %v596_v49, %v535_v28  ;;  %v673_v35 = vmul.f32 %v671_v34, %v1385_v26  ;;  %v674_v49 = vadd.f32 %v672_v47, %v1397_v42 }
 0x2d5   : > { %v586_v41 = vpop.f32.mrf.mxu0 }
 0x2d6   : > { %1138 = vpow2.f32 %v1061_v40  ;;  %v675_v36 = vadd.f32 %v673_v35, %v1391_v29 }
 0x2e3   : > { %v1139_v44 = vpop.eup %1138 }
 0x2e4   : > { %v593_v46 = vadd.f32 1.0, %v1139_v44 }
 0x2e6   : > { %1140 = vrcp.f32 %v593_v46 }
 0x2f3   : > { %v1141_v50 = vpop.eup %1140 }
 0x2f4   : > { %v597_v52 = vsub.f32 1.0, %v1141_v50 }
 0x2f6   : > { %v599_v53 = vmul.f32 %v598_v51, %v597_v52 }
 0x2f8   : > { %v600_v54 = vadd.f32 %v599_v53, %v535_v28 }
 0x2fa   : > { %1062 = vst [vmem:[%s1243_s29 + $0x10] sm:$0xff] %v600_v54  ;;  %v611_v55 = vpack.c.bf16 %v600_v54, %v600_v54 }
 0x2fc   : > { %645 = vmatmul.mubr.bf16.vlgmr.msra.gmra.mxu1 %v611_v55 }
 0x2fd   : > { %743 = vmatpush1.bf16.msra.mxu1 %v1256_v2  ;;  %774 = vmatprep.mubr.bf16.mxu1 %v1186_v3 }
 0x2fe   : > { %744 = vmatprep.subr.bf16.mxu1 %v1264_v4 }
 0x301   : > { %745 = vmatpush1.bf16.msra.mxu1 %v1271_v5 }
 0x302   : > { %746 = vmatprep.subr.bf16.mxu1 %v1278_v6 }
 0x305   : > { %747 = vmatpush1.bf16.msra.mxu1 %v1285_v7 }
 0x306   : > { %748 = vmatprep.subr.bf16.mxu1 %v1292_v8 }
 0x309   : > { %749 = vmatpush1.bf16.msra.mxu1 %v1299_v9 }
 0x30a   : > { %750 = vmatprep.subr.bf16.mxu1 %v1306_v10 }
 0x30d   : > { %751 = vmatpush1.bf16.msra.mxu1 %v1313_v11 }
 0x30e   : > { %752 = vmatprep.subr.bf16.mxu1 %v1320_v12 }
 0x311   : > { %753 = vmatpush1.bf16.msra.mxu1 %v1327_v13 }
 0x312   : > { %754 = vmatprep.subr.bf16.mxu1 %v1334_v14 }
 0x315   : > { %755 = vmatpush1.bf16.msra.mxu1 %v1341_v15 }
 0x316   : > { %756 = vmatprep.subr.bf16.mxu1 %v1348_v16 }
 0x319   : > { %757 = vmatpush1.bf16.msra.mxu1 %v1355_v17 }
 0x31a   : > { %872 = vmatprep.subr.bf16.mxu1 %v1251_v1  ;;  %v609_v1 = vadd.f32 %v607_v21, %v1397_v42 }
 0x3bc   : > { %v646_v60 = vpop.f32.mrf.mxu1 }
 0x3bd   : > { %v653_v23 = vadd.f32 %v646_v60, %v609_v1 }
 0x3be   : > { %v648_v61 = vpop.f32.mrf.mxu1 }
 0x3bf   : > { %v654_v62 = vadd.f32 %v648_v61, %v610_v59  ;;  %v661_v24 = vmax.f32 %v653_v23, 0.0 }
 0x3c0   : > { %v650_v63 = vpop.f32.mrf.mxu1 }
 0x3c1   : > { %v1064_v0 = vmul.f32 -1.442695, %v654_v62  ;;  %v663_v27 = vsub.f32 %v661_v24, %v600_v54 }
 0x3c2   : > { %v651_v18 = vpop.f32.mrf.mxu1 }
 0x3c3   : > { %1142 = vpow2.f32 %v1064_v0  ;;  %v1072_v18 = vld [vmem:[%s1238_s26 + $0x30] sm:$0xff] }
 0x3c4   : > { %v801_v19 = vunpack.c.h.bf16 %v1072_v18 }
 0x3d0   : > { %v1143_v20 = vpop.eup %1142 }
 0x3d1   : > { %v658_v22 = vadd.f32 1.0, %v1143_v20  ;;  %v803_v20 = vmul.f32 %v801_v19, %v1385_v26 }
 0x3d3   : > { %1144 = vrcp.f32 %v658_v22  ;;  %v805_v21 = vadd.f32 %v803_v20, %v1391_v29 }
 0x3e0   : > { %v1145_v25 = vpop.eup %1144 }
 0x3e1   : > { %v662_v28 = vsub.f32 1.0, %v1145_v25 }
 0x3e3   : > { %v664_v30 = vmul.f32 %v663_v27, %v662_v28  ;;  %v800_v28 = vunpack.c.l.bf16 %v1072_v18 }
 0x3e5   : > { %v665_v31 = vadd.f32 %v664_v30, %v600_v54 }
 0x3e7   : > { %1065 = vst [vmem:[%s1243_s29 + $0x18] sm:$0xff] %v665_v31  ;;  %v676_v32 = vpack.c.bf16 %v665_v31, %v665_v31 }
 0x3e9   : > { %710 = vmatmul.mubr.bf16.vlgmr.msra.gmra.mxu0 %v676_v32 }
 0x3ea   : > { %808 = vmatpush1.bf16.msra.mxu0 %v1256_v2  ;;  %839 = vmatprep.mubr.bf16.mxu0 %v1186_v3 }
 0x3eb   : > { %809 = vmatprep.subr.bf16.mxu0 %v1264_v4 }
 0x3ee   : > { %810 = vmatpush1.bf16.msra.mxu0 %v1271_v5 }
 0x3ef   : > { %811 = vmatprep.subr.bf16.mxu0 %v1278_v6 }
 0x3f2   : > { %812 = vmatpush1.bf16.msra.mxu0 %v1285_v7 }
 0x3f3   : > { %813 = vmatprep.subr.bf16.mxu0 %v1292_v8 }
 0x3f6   : > { %814 = vmatpush1.bf16.msra.mxu0 %v1299_v9 }
 0x3f7   : > { %815 = vmatprep.subr.bf16.mxu0 %v1306_v10 }
 0x3fa   : > { %816 = vmatpush1.bf16.msra.mxu0 %v1313_v11 }
 0x3fb   : > { %817 = vmatprep.subr.bf16.mxu0 %v1320_v12 }
 0x3fe   : > { %818 = vmatpush1.bf16.msra.mxu0 %v1327_v13 }
 0x3ff   : > { %819 = vmatprep.subr.bf16.mxu0 %v1334_v14 }
 0x402   : > { %820 = vmatpush1.bf16.msra.mxu0 %v1341_v15 }
 0x403   : > { %821 = vmatprep.subr.bf16.mxu0 %v1348_v16 }
 0x406   : > { %822 = vmatpush1.bf16.msra.mxu0 %v1355_v17 }
 0x4a9   : > { %v711_v37 = vpop.f32.mrf.mxu0 }
 0x4aa   : > { %v718_v50 = vadd.f32 %v711_v37, %v674_v49 }
 0x4ab   : > { %v713_v38 = vpop.f32.mrf.mxu0 }
 0x4ac   : > { %v719_v40 = vadd.f32 %v713_v38, %v675_v36  ;;  %v726_v51 = vmax.f32 %v718_v50, 0.0 }
 0x4ad   : > { %v715_v41 = vpop.f32.mrf.mxu0 }
 0x4ae   : > { %v1067_v43 = vmul.f32 -1.442695, %v719_v40  ;;  %v728_v53 = vsub.f32 %v726_v51, %v665_v31 }
 0x4af   : > { %v716_v44 = vpop.f32.mrf.mxu0 }
 0x4b0   : > { %1146 = vpow2.f32 %v1067_v43  ;;  %v1075_v44 = vld [vmem:[%s1238_s26 + $0x38] sm:$0xff] }
 0x4b1   : > { %v866_v45 = vunpack.c.h.bf16 %v1075_v44 }
 0x4bd   : > { %v1147_v46 = vpop.eup %1146 }
 0x4be   : > { %v723_v48 = vadd.f32 1.0, %v1147_v46  ;;  %v868_v46 = vmul.f32 %v866_v45, %v1385_v26 }
 0x4c0   : > { %1148 = vrcp.f32 %v723_v48  ;;  %v870_v47 = vadd.f32 %v868_v46, %v1391_v29 }
 0x4cd   : > { %v1149_v52 = vpop.eup %1148 }
 0x4ce   : > { %v727_v54 = vsub.f32 1.0, %v1149_v52 }
 0x4d0   : > { %v729_v55 = vmul.f32 %v728_v53, %v727_v54  ;;  %v865_v54 = vunpack.c.l.bf16 %v1075_v44 }
 0x4d2   : > { %v730_v56 = vadd.f32 %v729_v55, %v665_v31  ;;  %v802_v31 = vmul.f32 %v800_v28, %v1394_v39 }
 0x4d4   : > { %1068 = vst [vmem:[%s1243_s29 + $0x20] sm:$0xff] %v730_v56  ;;  %v741_v57 = vpack.c.bf16 %v730_v56, %v730_v56  ;;  %v804_v33 = vadd.f32 %v802_v31, %v1397_v42 }
 0x4d6   : > { %775 = vmatmul.mubr.bf16.vlgmr.msra.gmra.mxu1 %v741_v57 }
 0x4d7   : > { %873 = vmatpush1.bf16.msra.mxu1 %v1256_v2  ;;  %904 = vmatprep.mubr.bf16.mxu1 %v1186_v3  ;;  %v1069_v2 = vld [vmem:[%s1238_s26 + $0x28] sm:$0xff] }
 0x4d8   : > { %874 = vmatprep.subr.bf16.mxu1 %v1264_v4  ;;  %v736_v3 = vunpack.c.h.bf16 %v1069_v2 }
 0x4da   : > { %v738_v4 = vmul.f32 %v736_v3, %v1385_v26 }
 0x4db   : > { %875 = vmatpush1.bf16.msra.mxu1 %v1271_v5 }
 0x4dc   : > { %876 = vmatprep.subr.bf16.mxu1 %v1278_v6  ;;  %v740_v5 = vadd.f32 %v738_v4, %v1391_v29 }
 0x4df   : > { %877 = vmatpush1.bf16.msra.mxu1 %v1285_v7 }
 0x4e0   : > { %878 = vmatprep.subr.bf16.mxu1 %v1292_v8 }
 0x4e3   : > { %879 = vmatpush1.bf16.msra.mxu1 %v1299_v9 }
 0x4e4   : > { %880 = vmatprep.subr.bf16.mxu1 %v1306_v10 }
 0x4e7   : > { %881 = vmatpush1.bf16.msra.mxu1 %v1313_v11 }
 0x4e8   : > { %882 = vmatprep.subr.bf16.mxu1 %v1320_v12  ;;  %v735_v12 = vunpack.c.l.bf16 %v1069_v2 }
 0x4eb   : > { %883 = vmatpush1.bf16.msra.mxu1 %v1327_v13 }
 0x4ec   : > { %884 = vmatprep.subr.bf16.mxu1 %v1334_v14  ;;  %v737_v14 = vmul.f32 %v735_v12, %v1394_v39 }
 0x4ef   : > { %885 = vmatpush1.bf16.msra.mxu1 %v1341_v15 }
 0x4f0   : > { %886 = vmatprep.subr.bf16.mxu1 %v1348_v16  ;;  %v739_v16 = vadd.f32 %v737_v14, %v1397_v42 }
 0x4f3   : > { %887 = vmatpush1.bf16.msra.mxu1 %v1355_v17 }
 0x596   : > { %v776_v6 = vpop.f32.mrf.mxu1 }
 0x597   : > { %v783_v17 = vadd.f32 %v776_v6, %v739_v16 }
 0x598   : > { %v778_v7 = vpop.f32.mrf.mxu1 }
 0x599   : > { %v784_v8 = vadd.f32 %v778_v7, %v740_v5  ;;  %v791_v58 = vmax.f32 %v783_v17, 0.0 }
 0x59a   : > { %v780_v9 = vpop.f32.mrf.mxu1 }
 0x59b   : > { %v1070_v10 = vmul.f32 -1.442695, %v784_v8  ;;  %v793_v60 = vsub.f32 %v791_v58, %v730_v56 }
 0x59c   : > { %v781_v11 = vpop.f32.mrf.mxu1 }
 0x59d   : > { %1150 = vpow2.f32 %v1070_v10 }
 0x5aa   : > { %v1151_v13 = vpop.eup %1150 }
 0x5ab   : > { %v788_v15 = vadd.f32 1.0, %v1151_v13 }
 0x5ad   : > { %1152 = vrcp.f32 %v788_v15 }
 0x5ba   : > { %v1153_v59 = vpop.eup %1152 }
 0x5bb   : > { %v792_v61 = vsub.f32 1.0, %v1153_v59 }
 0x5bd   : > { %v794_v62 = vmul.f32 %v793_v60, %v792_v61 }
 0x5bf   : > { %v795_v63 = vadd.f32 %v794_v62, %v730_v56  ;;  %v867_v56 = vmul.f32 %v865_v54, %v1394_v39 }
 0x5c1   : > { %1071 = vst [vmem:[%s1243_s29 + $0x28] sm:$0xff] %v795_v63  ;;  %v806_v0 = vpack.c.bf16 %v795_v63, %v795_v63  ;;  %v869_v2 = vadd.f32 %v867_v56, %v1397_v42 }
 0x5c3   : > { %840 = vmatmul.mubr.bf16.vlgmr.msra.gmra.mxu0 %v806_v0 }
 0x683   : > { %v841_v22 = vpop.f32.mrf.mxu0 }
 0x684   : > { %v848_v34 = vadd.f32 %v841_v22, %v804_v33 }
 0x685   : > { %v843_v1 = vpop.f32.mrf.mxu0 }
 0x686   : > { %v849_v23 = vadd.f32 %v843_v1, %v805_v21  ;;  %v856_v35 = vmax.f32 %v848_v34, 0.0 }
 0x687   : > { %v845_v24 = vpop.f32.mrf.mxu0 }
 0x688   : > { %v1073_v25 = vmul.f32 -1.442695, %v849_v23  ;;  %v858_v37 = vsub.f32 %v856_v35, %v795_v63 }
 0x689   : > { %v846_v27 = vpop.f32.mrf.mxu0 }
 0x68a   : > { %1154 = vpow2.f32 %v1073_v25 }
 0x697   : > { %v1155_v30 = vpop.eup %1154 }
 0x698   : > { %v853_v32 = vadd.f32 1.0, %v1155_v30 }
 0x69a   : > { %1156 = vrcp.f32 %v853_v32 }
 0x6a7   : > { %v1157_v36 = vpop.eup %1156 }
 0x6a8   : > { %v857_v38 = vsub.f32 1.0, %v1157_v36 }
 0x6aa   : > { %v859_v40 = vmul.f32 %v858_v37, %v857_v38 }
 0x6ac   : > { %v860_v41 = vadd.f32 %v859_v40, %v795_v63 }
 0x6ae   : > { %1074 = vst [vmem:[%s1243_s29 + $0x30] sm:$0xff] %v860_v41  ;;  %v871_v43 = vpack.c.bf16 %v860_v41, %v860_v41 }
 0x6b0   : > { %905 = vmatmul.mubr.bf16.vlgmr.msra.gmra.mxu1 %v871_v43 }
 0x770   : > { %v906_v48 = vpop.f32.mrf.mxu1 }
 0x771   : > { %v913_v3 = vadd.f32 %v906_v48, %v869_v2 }
 0x772   : > { %v908_v49 = vpop.f32.mrf.mxu1 }
 0x773   : > { %v914_v50 = vadd.f32 %v908_v49, %v870_v47  ;;  %v921_v26 = vmax.f32 %v913_v3, 0.0 }
 0x774   : > { %v910_v51 = vpop.f32.mrf.mxu1 }
 0x775   : > { %v1076_v52 = vmul.f32 -1.442695, %v914_v50  ;;  %v923_v29 = vsub.f32 %v921_v26, %v860_v41 }
 0x776   : > { %v911_v53 = vpop.f32.mrf.mxu1 }
 0x777   : > { %1158 = vpow2.f32 %v1076_v52 }
 0x784   : > { %v1159_v55 = vpop.eup %1158 }
 0x785   : > { %v918_v57 = vadd.f32 1.0, %v1159_v55 }
 0x787   : > { %1160 = vrcp.f32 %v918_v57 }
 0x794   : > { %v1161_v4 = vpop.eup %1160 }
 0x795   : > { %v922_v5 = vsub.f32 1.0, %v1161_v4 }
 0x797   : > { %v924_v6 = vmul.f32 %v923_v29, %v922_v5 }
 0x799   : > { %v925_v7 = vadd.f32 %v924_v6, %v860_v41 }
 0x79b   : > { %1077 = vst [vmem:[%s1243_s29 + $0x38] sm:$0xff] %v925_v7  ;;  %928 = vst [vmem:[#allocation2] sm:$0xff] %v925_v7 }
 0x79c PF: > { %s15_s20 = sadd.s32 1, %s1184_s20   ;;  %s1541_s18 = smov %s1180_s19 }
 0x79d   : > { %p12_p6 = scmp.ge.s32.totalorder %s15_s20, 4   ;;  %s1542_s19 = smov %s1544_s21 }
 0x79f   :  { %14 = sbr.rel (!%p12_p6) target bundleno = 2 (0x2), region = 91 }

</bundles_post_ra>
